<compile_context>
chip_gen: v6e
topology: v6e:2x2x1
jax: 0.10.0
libtpu: 0.0.40
codegen_flags: <defaults>
</compile_context>

<pallas_src>
import functools

import jax
import jax.numpy as jnp
from jax import lax
from jax.experimental import pallas as pl
from jax.experimental.pallas import tpu as pltpu

_NEG = -1e30  # finite "minus infinity": avoids inf - inf -> NaN for node-less graphs


def _accumulate_kernel(map_col_ref, map_row_ref, x_ref,
                       w1_ref, b1_ref, w2s_rep_ref, b2s_rep_ref, w2t_ref, b2t_ref,
                       lane2graph_ref, graph_sel_ref, expand_ref,
                       m_ref, l_ref, n_ref,
                       *, hidden_s):
    """Per node-tile: fused MLPs + online per-(graph, head) segment softmax.

    Per-core accumulator state (the output refs themselves, resident across the
    "arbitrary" tile axis):
      m_ref [1, G*H]  running per-(graph, head) max of scores   (flat layout)
      l_ref [1, G*H]  running softmax denominator (sum of exp, shifted by m)
      n_ref [G, GR]   running numerator (sum of exp * head-expanded values)
    """
    k = pl.program_id(1)

    @pl.when(k == 0)
    def _init():
        m_ref[...] = jnp.full(m_ref.shape, _NEG, jnp.float32)
        l_ref[...] = jnp.zeros(l_ref.shape, jnp.float32)
        n_ref[...] = jnp.zeros(n_ref.shape, jnp.float32)

    tv = x_ref.shape[0]
    num_graphs = n_ref.shape[0]

    # --- graph-membership masks rebuilt in-kernel (never stored dense in HBM) ---
    # mask_rep[v, g*H + h] = (node v belongs to graph g);  lane2graph is a static
    # [1, G*H] column->graph table (avoids an in-kernel integer divide).
    mask_rep = map_col_ref[...] == lane2graph_ref[...]                   # [TV, G*H] bool
    onehot_gv = jnp.where(
        lax.broadcasted_iota(jnp.int32, (num_graphs, tv), 0) == map_row_ref[...],
        1.0, 0.0)                                                        # [G, TV] f32

    # --- fused layer-1 of both MLPs: one [TV, F] @ [F, 2*hidden] MXU pass ---
    h_all = jnp.dot(x_ref[...], w1_ref[...],
                    preferred_element_type=jnp.float32) + b1_ref[...]
    h_all = jnp.maximum(h_all, 0.0)                                      # ReLU
    hs = h_all[:, :hidden_s].astype(jnp.bfloat16)                        # 128-aligned slice
    ht = h_all[:, hidden_s:].astype(jnp.bfloat16)

    # Scoring head: weights pre-replicated G times along lanes in the wrapper, so
    # the MXU emits scores directly in the flat [TV, G*H] layout (no in-kernel
    # tiling / transposes / per-head loop).
    scores_rep = jnp.dot(hs, w2s_rep_ref[...],
                         preferred_element_type=jnp.float32) + b2s_rep_ref[...]  # [TV, G*H]
    values = jnp.dot(ht, w2t_ref[...],
                     preferred_element_type=jnp.float32) + b2t_ref[...]           # [TV, GR]

    # --- online per-(graph, head) softmax, all in the flat [1, G*H] layout ---
    masked = jnp.where(mask_rep, scores_rep, _NEG)                       # [TV, G*H]
    tile_max = jnp.max(masked, axis=0, keepdims=True)                    # [1, G*H]
    m_old = m_ref[...]
    m_new = jnp.maximum(m_old, tile_max)                                 # [1, G*H]
    alpha = jnp.exp(m_old - m_new)                                       # [1, G*H]

    # exp(score - running max) for each node at its own graph's columns; exact f32.
    e = jnp.where(mask_rep, jnp.exp(scores_rep - m_new), 0.0)            # [TV, G*H]
    seg_e = jnp.sum(e, axis=0, keepdims=True)                            # [1, G*H] (VPU, exact)

    # head h's weight applies to the h-th contiguous GR//H slice of values;
    # expand_ref[g*H+h, :] selects that slice -> one [TV, G*H] @ [G*H, GR] pass.
    w_exp = jnp.dot(e, expand_ref[...], preferred_element_type=jnp.float32)   # [TV, GR]
    weighted = w_exp * values                                                  # [TV, GR]
    seg_w = jnp.dot(onehot_gv, weighted, preferred_element_type=jnp.float32)   # [G, GR]

    # rescale factor for the running numerator, spread to [G, GR] (exact 0/1 select)
    alpha_exp = jnp.dot(graph_sel_ref[...] * alpha, expand_ref[...],
                        preferred_element_type=jnp.float32)                    # [G, GR]

    m_ref[...] = m_new
    l_ref[...] = alpha * l_ref[...] + seg_e
    n_ref[...] = alpha_exp * n_ref[...] + seg_w


def _lift_kernel(map_col_ref, reps_ref, out_ref):
    """out[v, :] = graph_reps[node_to_graph_map[v], :] (index_select as exact one-hot matmul).

    NOTE: this pass is pure HBM writeback; a plain-XLA gather
    (graph_reps[node_to_graph_map]) that fuses into the consumer is a valid
    alternative if the Pallas boundary is not required here.
    """
    tv = out_ref.shape[0]
    num_graphs = reps_ref.shape[0]
    onehot = jnp.where(
        map_col_ref[...] == lax.broadcasted_iota(jnp.int32, (tv, num_graphs), 1),
        1.0, 0.0)                                                        # [TV, G] f32
    out_ref[...] = jnp.dot(onehot, reps_ref[...],
                           preferred_element_type=jnp.float32)
    # TODO(synk): final nn.Dropout(p=dropout_prob) treated as identity (eval mode).


def graph_global_exchange(x, node_to_graph_map, num_graphs, params, *,
                          tile_v=512, num_cores=None, vmem_limit_bytes=None):
    """Per-node lifted graph representations, [V, num_graph_features] (f32).

    Notes:
      * V must be a multiple of tile_v. If callers pad V, padded rows of
        node_to_graph_map must use an out-of-range graph id (>= num_graphs) so
        their one-hot rows are all-zero.
      * For very large tile_v (> ~2048) on v5e, pass vmem_limit_bytes explicitly
        (v5e's default scoped VMEM is 16 MiB).
    """
    V, F = x.shape
    G = int(num_graphs)
    hidden_s = params["w1s"].shape[1]
    hidden_t = params["w1t"].shape[1]
    H = params["w2s"].shape[1]
    GR = params["w2t"].shape[1]
    GH = G * H
    d = GR // H
    assert GR % H == 0, "num_graph_features must be divisible by num_heads"
    # The fused layer-1 output is lane-sliced at `hidden_s`; keep it 128-aligned
    # so the slice is free (a misaligned slice would force a per-step relayout).
    assert hidden_s % 128 == 0, "scoring-MLP hidden size must be a multiple of 128"

    tile_v = min(tile_v, V)
    assert tile_v % 128 == 0 and V % tile_v == 0, \
        "tile_v must be a multiple of 128 and divide V"
    num_tiles = V // tile_v
    if num_cores is None:
        # v7x has 2 TensorCores per chip; splitting the tile range across them via a
        # leading "parallel" axis is harmless (a plain outer loop) on v5e/v6e.
        num_cores = 2 if (num_tiles >= 2 and num_tiles % 2 == 0) else 1
    assert num_tiles % num_cores == 0
    tiles_per_core = num_tiles // num_cores

    # bf16 storage for MXU inputs; f32 accumulation inside the kernel.
    x_bf16 = x.astype(jnp.bfloat16)
    # fuse layer-1 of the scoring + transformation MLPs into one weight matrix
    w1_cat = jnp.concatenate([params["w1s"], params["w1t"]], axis=1).astype(jnp.bfloat16)
    b1_cat = jnp.concatenate([params["b1s"], params["b1t"]], axis=1).astype(jnp.float32)
    # scoring head replicated G times along output lanes -> the kernel's MXU emits
    # scores directly in the flat per-(graph, head) layout.
    w2s_rep = jnp.tile(params["w2s"].astype(jnp.bfloat16), (1, G))       # [HS, G*H]
    b2s_rep = jnp.tile(params["b2s"].astype(jnp.float32), (1, G))        # [1, G*H]
    w2t = params["w2t"].astype(jnp.bfloat16)
    b2t = params["b2t"].astype(jnp.float32)

    node2graph = node_to_graph_map.astype(jnp.int32)
    # map_col is kept as an input on purpose: its lane-padded VMEM cost is small
    # and its DMA is pipelined, keeping the membership mask off the compute chain.
    map_col = node2graph.reshape(V, 1)
    map_row = node2graph.reshape(1, V)

    # static constants, hoisted out of the kernel
    flat = jnp.arange(GH, dtype=jnp.int32)
    lane2graph = (flat // H).reshape(1, GH)                                       # [1, G*H]
    graph_sel = (jnp.arange(G, dtype=jnp.int32)[:, None]
                 == (flat // H)[None, :]).astype(jnp.float32)                     # [G, G*H]
    expand_flat = ((flat % H)[:, None]
                   == (jnp.arange(GR, dtype=jnp.int32)[None, :] // d)
                   ).astype(jnp.float32)                                          # [G*H, GR]

    def const(shape):
        return pl.BlockSpec(shape, lambda c, k: (0, 0))

    kernel = functools.partial(_accumulate_kernel, hidden_s=hidden_s)

    # ---- pass 1: per-core partial (m, l, n) over node tiles -------------------
    m_part, l_part, n_part = pl.pallas_call(
        kernel,
        out_shape=(jax.ShapeDtypeStruct((num_cores, 1, GH), jnp.float32),
                   jax.ShapeDtypeStruct((num_cores, 1, GH), jnp.float32),
                   jax.ShapeDtypeStruct((num_cores, G, GR), jnp.float32)),
        grid_spec=pltpu.PrefetchScalarGridSpec(
            num_scalar_prefetch=0,
            grid=(num_cores, tiles_per_core),
            in_specs=[
                pl.BlockSpec((tile_v, 1), lambda c, k: (c * tiles_per_core + k, 0)),
                pl.BlockSpec((1, tile_v), lambda c, k: (0, c * tiles_per_core + k)),
                pl.BlockSpec((tile_v, F), lambda c, k: (c * tiles_per_core + k, 0)),
                const((F, hidden_s + hidden_t)),          # fused w1
                const((1, hidden_s + hidden_t)),          # fused b1
                const((hidden_s, GH)),                    # w2 scoring, replicated
                const((1, GH)),                           # b2 scoring, replicated
                const((hidden_t, GR)),                    # w2 transformation
                const((1, GR)),                           # b2 transformation
                const((1, GH)),                           # lane -> graph table
                const((G, GH)),                           # flat -> graph selector
                const((GH, GR)),                          # flat -> head expansion
            ],
            out_specs=(pl.BlockSpec((None, 1, GH), lambda c, k: (c, 0, 0)),
                       pl.BlockSpec((None, 1, GH), lambda c, k: (c, 0, 0)),
                       pl.BlockSpec((None, G, GR), lambda c, k: (c, 0, 0)))),
        compiler_params=pltpu.CompilerParams(
            dimension_semantics=("parallel", "arbitrary"),
            vmem_limit_bytes=vmem_limit_bytes),
    )(map_col, map_row, x_bf16, w1_cat, b1_cat, w2s_rep, b2s_rep, w2t, b2t,
      lane2graph, graph_sel, expand_flat)

    # ---- merge the per-core partials (tiny, plain XLA; exact f32 division) ----
    m_part = m_part.reshape(num_cores, GH)
    l_part = l_part.reshape(num_cores, GH)
    m = jnp.max(m_part, axis=0)                                          # [G*H]
    scale = jnp.exp(m_part - m[None, :])                                 # [C, G*H]
    l_tot = jnp.sum(l_part * scale, axis=0)                              # [G*H]
    n_tot = jnp.sum(n_part * jnp.repeat(scale.reshape(num_cores, G, H), d, axis=2),
                    axis=0)                                              # [G, GR]
    l_exp = jnp.repeat(l_tot.reshape(G, H), d, axis=1)                   # [G, GR]
    # graphs with zero nodes have l == 0 and n == 0 -> emit 0, never NaN
    graph_reps = jnp.where(l_exp > 0.0, n_tot / jnp.where(l_exp > 0.0, l_exp, 1.0), 0.0)

    # ---- pass 2: lift graph reps back to nodes (independent node tiles) -------
    lifted = pl.pallas_call(
        _lift_kernel,
        out_shape=jax.ShapeDtypeStruct((V, GR), jnp.float32),
        grid_spec=pltpu.PrefetchScalarGridSpec(
            num_scalar_prefetch=0,
            grid=(num_tiles,),
            in_specs=[pl.BlockSpec((tile_v, 1), lambda i: (i, 0)),
                      pl.BlockSpec((G, GR), lambda i: (0, 0))],
            out_specs=pl.BlockSpec((tile_v, GR), lambda i: (i, 0))),
        compiler_params=pltpu.CompilerParams(
            dimension_semantics=("parallel",)),
    )(map_col, graph_reps)
    return lifted


def _reference(x, node_to_graph_map, num_graphs, params):
    """Pure-JAX reference mirroring the PyTorch semantics (eval mode)."""
    hs = jax.nn.relu(x @ params["w1s"] + params["b1s"])
    scores = hs @ params["w2s"] + params["b2s"]                          # [V, H]
    max_g = jax.ops.segment_max(scores, node_to_graph_map, num_graphs)
    e = jnp.exp(scores - max_g[node_to_graph_map])
    denom = jax.ops.segment_sum(e, node_to_graph_map, num_graphs)
    weights = e / denom[node_to_graph_map]                               # [V, H]

    ht = jax.nn.relu(x @ params["w1t"] + params["b1t"])
    values = ht @ params["w2t"] + params["b2t"]                          # [V, GR]
    V, GR = values.shape
    H = weights.shape[1]
    weighted = (weights[:, :, None] * values.reshape(V, H, GR // H)).reshape(V, GR)
    graph_reps = jax.ops.segment_sum(weighted, node_to_graph_map, num_graphs)
    return graph_reps[node_to_graph_map]


def _init_params(key, num_node_features, num_graph_features, num_heads, hidden):
    ks = jax.random.split(key, 8)
    s = 0.1
    return {
        # scoring MLP (one hidden layer, ReLU, linear head -> num_heads)
        "w1s": s * jax.random.normal(ks[0], (num_node_features, hidden), jnp.float32),
        "b1s": s * jax.random.normal(ks[1], (1, hidden), jnp.float32),
        "w2s": s * jax.random.normal(ks[2], (hidden, num_heads), jnp.float32),
        "b2s": s * jax.random.normal(ks[3], (1, num_heads), jnp.float32),
        # transformation MLP (one hidden layer, ReLU, linear -> num_graph_features)
        "w1t": s * jax.random.normal(ks[4], (num_node_features, hidden), jnp.float32),
        "b1t": s * jax.random.normal(ks[5], (1, hidden), jnp.float32),
        "w2t": s * jax.random.normal(ks[6], (hidden, num_graph_features), jnp.float32),
        "b2t": s * jax.random.normal(ks[7], (1, num_graph_features), jnp.float32),
    }


if __name__ == "__main__":
    V = 1024       # total nodes across the batch of graphs
    G = 8          # number of graphs
    F = 64         # num_node_features
    GR = 128       # num_graph_features (multiple of 128 -> lane-dense output stores)
    H = 4          # num_heads
    HIDDEN = 128   # MLP hidden size (tf2-gnn style default)
    # Small tile so this toy size exercises both the per-core multi-tile online
    # softmax and the two-core partial merge; production default is tile_v=512.
    TILE_V = 256

    key = jax.random.PRNGKey(0)
    k_x, k_m, k_p = jax.random.split(key, 3)
    x = jax.random.normal(k_x, (V, F), jnp.float32)
    # arbitrary (non-contiguous) node->graph assignment; kernel does not assume sorting
    node_to_graph_map = jax.random.randint(k_m, (V,), 0, G, dtype=jnp.int32)
    params = _init_params(k_p, F, GR, H, HIDDEN)

    out = graph_global_exchange(x, node_to_graph_map, G, params, tile_v=TILE_V)
    out = jax.block_until_ready(out)
    assert out.shape == (V, GR)
    assert not bool(jnp.any(jnp.isnan(out)))

    # compare against the pure-JAX reference evaluated at the kernel's storage
    # precision (bf16 x / weights, f32 accumulation on both sides)
    xq = x.astype(jnp.bfloat16).astype(jnp.float32)
    params_q = {k: (v.astype(jnp.bfloat16).astype(jnp.float32)
                    if k.startswith("w") else v) for k, v in params.items()}
    ref = _reference(xq, node_to_graph_map, G, params_q)
    assert jnp.allclose(out, ref, rtol=2e-2, atol=2e-2), "mismatch vs pure-JAX reference"
    print("KERNEL_OK")
</pallas_src>

<mosaic_0001>
module attributes {stable_mosaic.version = 11 : i64} {
  func.func @_accumulate_kernel(%arg0: i32, %arg1: i32, %arg2: memref<256x1xi32, #tpu.memory_space<vmem>>, %arg3: memref<1x256xi32, #tpu.memory_space<vmem>>, %arg4: memref<256x64xbf16, #tpu.memory_space<vmem>>, %arg5: memref<64x256xbf16, #tpu.memory_space<vmem>>, %arg6: memref<1x256xf32, #tpu.memory_space<vmem>>, %arg7: memref<128x32xbf16, #tpu.memory_space<vmem>>, %arg8: memref<1x32xf32, #tpu.memory_space<vmem>>, %arg9: memref<128x128xbf16, #tpu.memory_space<vmem>>, %arg10: memref<1x128xf32, #tpu.memory_space<vmem>>, %arg11: memref<1x32xi32, #tpu.memory_space<vmem>>, %arg12: memref<8x32xf32, #tpu.memory_space<vmem>>, %arg13: memref<32x128xf32, #tpu.memory_space<vmem>>, %arg14: memref<1x1x32xf32, #tpu.memory_space<vmem>>, %arg15: memref<1x1x32xf32, #tpu.memory_space<vmem>>, %arg16: memref<1x8x128xf32, #tpu.memory_space<vmem>>) attributes {dimension_semantics = [#tpu.dimension_semantics<parallel>, #tpu.dimension_semantics<arbitrary>], iteration_bounds = array<i64: 2, 2>, scalar_prefetch = 0 : i64, scratch_operands = 0 : i64, tpu.core_type = #tpu.core_type<tc>, window_params = [{transform_indices = @transform_0, window_bounds = array<i64: 256, 1>}, {transform_indices = @transform_1, window_bounds = array<i64: 1, 256>}, {transform_indices = @transform_2, window_bounds = array<i64: 256, 64>}, {pipeline_mode = #tpu.pipeline_mode<synchronous>, transform_indices = @transform_3, window_bounds = array<i64: 64, 256>}, {pipeline_mode = #tpu.pipeline_mode<synchronous>, transform_indices = @transform_4, window_bounds = array<i64: 1, 256>}, {pipeline_mode = #tpu.pipeline_mode<synchronous>, transform_indices = @transform_5, window_bounds = array<i64: 128, 32>}, {pipeline_mode = #tpu.pipeline_mode<synchronous>, transform_indices = @transform_6, window_bounds = array<i64: 1, 32>}, {pipeline_mode = #tpu.pipeline_mode<synchronous>, transform_indices = @transform_7, window_bounds = array<i64: 128, 128>}, {pipeline_mode = #tpu.pipeline_mode<synchronous>, transform_indices = @transform_8, window_bounds = array<i64: 1, 128>}, {pipeline_mode = #tpu.pipeline_mode<synchronous>, transform_indices = @transform_9, window_bounds = array<i64: 1, 32>}, {pipeline_mode = #tpu.pipeline_mode<synchronous>, transform_indices = @transform_10, window_bounds = array<i64: 8, 32>}, {pipeline_mode = #tpu.pipeline_mode<synchronous>, transform_indices = @transform_11, window_bounds = array<i64: 32, 128>}, {transform_indices = @transform_12, window_bounds = array<i64: 1, 1, 32>}, {transform_indices = @transform_13, window_bounds = array<i64: 1, 1, 32>}, {transform_indices = @transform_14, window_bounds = array<i64: 1, 8, 128>}]} {
    %c0_i32 = arith.constant 0 : i32
    %0 = arith.cmpi eq, %arg1, %c0_i32 : i32
    %1 = arith.extui %0 : i1 to i32
    %c0_i32_0 = arith.constant 0 : i32
    %2 = arith.cmpi ne, %1, %c0_i32_0 : i32
    scf.if %2 {
      %cst_56 = arith.constant -1.000000e+30 : f32
      %79 = vector.broadcast %cst_56 : f32 to vector<1x32xf32>
      %c0_57 = arith.constant 0 : index
      %c0_58 = arith.constant 0 : index
      %c0_59 = arith.constant 0 : index
      %80 = vector.load %arg14[%c0_57, %c0_58, %c0_59] : memref<1x1x32xf32, #tpu.memory_space<vmem>>, vector<1x1x32xf32>
      %81 = vector.shape_cast %80 : vector<1x1x32xf32> to vector<1x32xf32>
      %82 = vector.shape_cast %79 : vector<1x32xf32> to vector<1x1x32xf32>
      tpu.vector_store %arg14[%c0_57, %c0_58, %c0_59], %82 {strides = array<i32>} : memref<1x1x32xf32, #tpu.memory_space<vmem>>, vector<1x1x32xf32>,
      %cst_60 = arith.constant 0.000000e+00 : f32
      %83 = vector.broadcast %cst_60 : f32 to vector<1x32xf32>
      %c0_61 = arith.constant 0 : index
      %c0_62 = arith.constant 0 : index
      %c0_63 = arith.constant 0 : index
      %84 = vector.load %arg15[%c0_61, %c0_62, %c0_63] : memref<1x1x32xf32, #tpu.memory_space<vmem>>, vector<1x1x32xf32>
      %85 = vector.shape_cast %84 : vector<1x1x32xf32> to vector<1x32xf32>
      %86 = vector.shape_cast %83 : vector<1x32xf32> to vector<1x1x32xf32>
      tpu.vector_store %arg15[%c0_61, %c0_62, %c0_63], %86 {strides = array<i32>} : memref<1x1x32xf32, #tpu.memory_space<vmem>>, vector<1x1x32xf32>,
      %cst_64 = arith.constant 0.000000e+00 : f32
      %87 = vector.broadcast %cst_64 : f32 to vector<8x128xf32>
      %c0_65 = arith.constant 0 : index
      %c0_66 = arith.constant 0 : index
      %c0_67 = arith.constant 0 : index
      %88 = vector.load %arg16[%c0_65, %c0_66, %c0_67] : memref<1x8x128xf32, #tpu.memory_space<vmem>>, vector<1x8x128xf32>
      %89 = vector.shape_cast %88 : vector<1x8x128xf32> to vector<8x128xf32>
      %90 = vector.shape_cast %87 : vector<8x128xf32> to vector<1x8x128xf32>
      tpu.vector_store %arg16[%c0_65, %c0_66, %c0_67], %90 {strides = array<i32>} : memref<1x8x128xf32, #tpu.memory_space<vmem>>, vector<1x8x128xf32>,
    } else {
    }
    %c0 = arith.constant 0 : index
    %c0_1 = arith.constant 0 : index
    %3 = vector.load %arg2[%c0, %c0_1] : memref<256x1xi32, #tpu.memory_space<vmem>>, vector<256x1xi32>
    %c0_2 = arith.constant 0 : index
    %c0_3 = arith.constant 0 : index
    %4 = vector.load %arg11[%c0_2, %c0_3] : memref<1x32xi32, #tpu.memory_space<vmem>>, vector<1x32xi32>
    %5 = vector.broadcast %3 : vector<256x1xi32> to vector<256x32xi32>
    %6 = vector.broadcast %4 : vector<1x32xi32> to vector<256x32xi32>
    %7 = arith.cmpi eq, %5, %6 : vector<256x32xi32>
    %8 = tpu.iota {dimensions = array<i32: 0>} : vector<8x256xi32>
    %c0_4 = arith.constant 0 : index
    %c0_5 = arith.constant 0 : index
    %9 = vector.load %arg3[%c0_4, %c0_5] : memref<1x256xi32, #tpu.memory_space<vmem>>, vector<1x256xi32>
    %10 = vector.broadcast %9 : vector<1x256xi32> to vector<8x256xi32>
    %11 = arith.cmpi eq, %8, %10 : vector<8x256xi32>
    %cst = arith.constant 1.000000e+00 : f32
    %cst_6 = arith.constant 0.000000e+00 : f32
    %12 = vector.broadcast %cst : f32 to vector<8x256xf32>
    %13 = vector.broadcast %cst_6 : f32 to vector<8x256xf32>
    %14 = arith.select %11, %12, %13 : vector<8x256xi1>, vector<8x256xf32>
    %c0_7 = arith.constant 0 : index
    %c0_8 = arith.constant 0 : index
    %15 = vector.load %arg4[%c0_7, %c0_8] : memref<256x64xbf16, #tpu.memory_space<vmem>>, vector<256x64xbf16>
    %c0_9 = arith.constant 0 : index
    %c0_10 = arith.constant 0 : index
    %16 = vector.load %arg5[%c0_9, %c0_10] : memref<64x256xbf16, #tpu.memory_space<vmem>>, vector<64x256xbf16>
    %cst_11 = arith.constant dense<0.000000e+00> : vector<256x256xf32>
    %17 = tpu.matmul %15, %16, %cst_11 {dimension_numbers = #tpu.dot_dimension_numbers<[1], [0], [0], [1], [0, 0, 1, 1], [], []>} : vector<256x64xbf16>, vector<64x256xbf16>, vector<256x256xf32> -> vector<256x256xf32>
    %c0_12 = arith.constant 0 : index
    %c0_13 = arith.constant 0 : index
    %18 = vector.load %arg6[%c0_12, %c0_13] : memref<1x256xf32, #tpu.memory_space<vmem>>, vector<1x256xf32>
    %19 = vector.broadcast %18 : vector<1x256xf32> to vector<256x256xf32>
    %20 = arith.addf %17, %19 : vector<256x256xf32>
    %cst_14 = arith.constant 0.000000e+00 : f32
    %21 = vector.broadcast %cst_14 : f32 to vector<256x256xf32>
    %22 = arith.maximumf %20, %21 : vector<256x256xf32>
    %23 = vector.extract_strided_slice %22 {offsets = [0, 0], sizes = [256, 128], strides = [1, 1]} : vector<256x256xf32> to vector<256x128xf32>
    %24 = arith.truncf %23 : vector<256x128xf32> to vector<256x128xbf16>
    %25 = vector.extract_strided_slice %22 {offsets = [0, 128], sizes = [256, 128], strides = [1, 1]} : vector<256x256xf32> to vector<256x128xf32>
    %26 = arith.truncf %25 : vector<256x128xf32> to vector<256x128xbf16>
    %c0_15 = arith.constant 0 : index
    %c0_16 = arith.constant 0 : index
    %27 = vector.load %arg7[%c0_15, %c0_16] : memref<128x32xbf16, #tpu.memory_space<vmem>>, vector<128x32xbf16>
    %cst_17 = arith.constant dense<0.000000e+00> : vector<256x32xf32>
    %28 = tpu.matmul %24, %27, %cst_17 {dimension_numbers = #tpu.dot_dimension_numbers<[1], [0], [0], [1], [0, 0, 1, 1], [], []>} : vector<256x128xbf16>, vector<128x32xbf16>, vector<256x32xf32> -> vector<256x32xf32>
    %c0_18 = arith.constant 0 : index
    %c0_19 = arith.constant 0 : index
    %29 = vector.load %arg8[%c0_18, %c0_19] : memref<1x32xf32, #tpu.memory_space<vmem>>, vector<1x32xf32>
    %30 = vector.broadcast %29 : vector<1x32xf32> to vector<256x32xf32>
    %31 = arith.addf %28, %30 : vector<256x32xf32>
    %c0_20 = arith.constant 0 : index
    %c0_21 = arith.constant 0 : index
    %32 = vector.load %arg9[%c0_20, %c0_21] : memref<128x128xbf16, #tpu.memory_space<vmem>>, vector<128x128xbf16>
    %cst_22 = arith.constant dense<0.000000e+00> : vector<256x128xf32>
    %33 = tpu.matmul %26, %32, %cst_22 {dimension_numbers = #tpu.dot_dimension_numbers<[1], [0], [0], [1], [0, 0, 1, 1], [], []>} : vector<256x128xbf16>, vector<128x128xbf16>, vector<256x128xf32> -> vector<256x128xf32>
    %c0_23 = arith.constant 0 : index
    %c0_24 = arith.constant 0 : index
    %34 = vector.load %arg10[%c0_23, %c0_24] : memref<1x128xf32, #tpu.memory_space<vmem>>, vector<1x128xf32>
    %35 = vector.broadcast %34 : vector<1x128xf32> to vector<256x128xf32>
    %36 = arith.addf %33, %35 : vector<256x128xf32>
    %cst_25 = arith.constant -1.000000e+30 : f32
    %37 = vector.broadcast %cst_25 : f32 to vector<256x32xf32>
    %38 = arith.select %7, %31, %37 : vector<256x32xi1>, vector<256x32xf32>
    %cst_26 = arith.constant dense<0xFF800000> : vector<32xf32>
    %39 = vector.multi_reduction <maximumf>, %38, %cst_26 [0] : vector<256x32xf32> to vector<32xf32>
    %40 = vector.shape_cast %39 : vector<32xf32> to vector<1x32xf32>
    %c0_27 = arith.constant 0 : index
    %c0_28 = arith.constant 0 : index
    %c0_29 = arith.constant 0 : index
    %41 = vector.load %arg14[%c0_27, %c0_28, %c0_29] : memref<1x1x32xf32, #tpu.memory_space<vmem>>, vector<1x1x32xf32>
    %42 = vector.shape_cast %41 : vector<1x1x32xf32> to vector<1x32xf32>
    %43 = arith.maximumf %42, %40 : vector<1x32xf32>
    %44 = arith.subf %42, %43 : vector<1x32xf32>
    %45 = math.exp %44 : vector<1x32xf32>
    %46 = vector.broadcast %43 : vector<1x32xf32> to vector<256x32xf32>
    %47 = arith.subf %31, %46 : vector<256x32xf32>
    %48 = math.exp %47 : vector<256x32xf32>
    %cst_30 = arith.constant 0.000000e+00 : f32
    %49 = vector.broadcast %cst_30 : f32 to vector<256x32xf32>
    %50 = arith.select %7, %48, %49 : vector<256x32xi1>, vector<256x32xf32>
    %cst_31 = arith.constant dense<0.000000e+00> : vector<32xf32>
    %51 = vector.multi_reduction <add>, %50, %cst_31 [0] : vector<256x32xf32> to vector<32xf32>
    %52 = vector.shape_cast %51 : vector<32xf32> to vector<1x32xf32>
    %c0_32 = arith.constant 0 : index
    %c0_33 = arith.constant 0 : index
    %53 = vector.load %arg13[%c0_32, %c0_33] : memref<32x128xf32, #tpu.memory_space<vmem>>, vector<32x128xf32>
    %cst_34 = arith.constant dense<0.000000e+00> : vector<256x128xf32>
    %54 = tpu.matmul %50, %53, %cst_34 {dimension_numbers = #tpu.dot_dimension_numbers<[1], [0], [0], [1], [0, 0, 1, 1], [], []>} : vector<256x32xf32>, vector<32x128xf32>, vector<256x128xf32> -> vector<256x128xf32>
    %55 = arith.mulf %54, %36 : vector<256x128xf32>
    %cst_35 = arith.constant dense<0.000000e+00> : vector<8x128xf32>
    %56 = tpu.matmul %14, %55, %cst_35 {dimension_numbers = #tpu.dot_dimension_numbers<[1], [0], [0], [1], [0, 0, 1, 1], [], []>} : vector<8x256xf32>, vector<256x128xf32>, vector<8x128xf32> -> vector<8x128xf32>
    %c0_36 = arith.constant 0 : index
    %c0_37 = arith.constant 0 : index
    %57 = vector.load %arg12[%c0_36, %c0_37] : memref<8x32xf32, #tpu.memory_space<vmem>>, vector<8x32xf32>
    %58 = vector.broadcast %45 : vector<1x32xf32> to vector<8x32xf32>
    %59 = arith.mulf %57, %58 : vector<8x32xf32>
    %c0_38 = arith.constant 0 : index
    %c0_39 = arith.constant 0 : index
    %60 = vector.load %arg13[%c0_38, %c0_39] : memref<32x128xf32, #tpu.memory_space<vmem>>, vector<32x128xf32>
    %cst_40 = arith.constant dense<0.000000e+00> : vector<8x128xf32>
    %61 = tpu.matmul %59, %60, %cst_40 {dimension_numbers = #tpu.dot_dimension_numbers<[1], [0], [0], [1], [0, 0, 1, 1], [], []>} : vector<8x32xf32>, vector<32x128xf32>, vector<8x128xf32> -> vector<8x128xf32>
    %c0_41 = arith.constant 0 : index
    %c0_42 = arith.constant 0 : index
    %c0_43 = arith.constant 0 : index
    %62 = vector.load %arg14[%c0_41, %c0_42, %c0_43] : memref<1x1x32xf32, #tpu.memory_space<vmem>>, vector<1x1x32xf32>
    %63 = vector.shape_cast %62 : vector<1x1x32xf32> to vector<1x32xf32>
    %64 = vector.shape_cast %43 : vector<1x32xf32> to vector<1x1x32xf32>
    tpu.vector_store %arg14[%c0_41, %c0_42, %c0_43], %64 {strides = array<i32>} : memref<1x1x32xf32, #tpu.memory_space<vmem>>, vector<1x1x32xf32>,
    %c0_44 = arith.constant 0 : index
    %c0_45 = arith.constant 0 : index
    %c0_46 = arith.constant 0 : index
    %65 = vector.load %arg15[%c0_44, %c0_45, %c0_46] : memref<1x1x32xf32, #tpu.memory_space<vmem>>, vector<1x1x32xf32>
    %66 = vector.shape_cast %65 : vector<1x1x32xf32> to vector<1x32xf32>
    %67 = arith.mulf %45, %66 : vector<1x32xf32>
    %68 = arith.addf %67, %52 : vector<1x32xf32>
    %c0_47 = arith.constant 0 : index
    %c0_48 = arith.constant 0 : index
    %c0_49 = arith.constant 0 : index
    %69 = vector.load %arg15[%c0_47, %c0_48, %c0_49] : memref<1x1x32xf32, #tpu.memory_space<vmem>>, vector<1x1x32xf32>
    %70 = vector.shape_cast %69 : vector<1x1x32xf32> to vector<1x32xf32>
    %71 = vector.shape_cast %68 : vector<1x32xf32> to vector<1x1x32xf32>
    tpu.vector_store %arg15[%c0_47, %c0_48, %c0_49], %71 {strides = array<i32>} : memref<1x1x32xf32, #tpu.memory_space<vmem>>, vector<1x1x32xf32>,
    %c0_50 = arith.constant 0 : index
    %c0_51 = arith.constant 0 : index
    %c0_52 = arith.constant 0 : index
    %72 = vector.load %arg16[%c0_50, %c0_51, %c0_52] : memref<1x8x128xf32, #tpu.memory_space<vmem>>, vector<1x8x128xf32>
    %73 = vector.shape_cast %72 : vector<1x8x128xf32> to vector<8x128xf32>
    %74 = arith.mulf %61, %73 : vector<8x128xf32>
    %75 = arith.addf %74, %56 : vector<8x128xf32>
    %c0_53 = arith.constant 0 : index
    %c0_54 = arith.constant 0 : index
    %c0_55 = arith.constant 0 : index
    %76 = vector.load %arg16[%c0_53, %c0_54, %c0_55] : memref<1x8x128xf32, #tpu.memory_space<vmem>>, vector<1x8x128xf32>
    %77 = vector.shape_cast %76 : vector<1x8x128xf32> to vector<8x128xf32>
    %78 = vector.shape_cast %75 : vector<8x128xf32> to vector<1x8x128xf32>
    tpu.vector_store %arg16[%c0_53, %c0_54, %c0_55], %78 {strides = array<i32>} : memref<1x8x128xf32, #tpu.memory_space<vmem>>, vector<1x8x128xf32>,
    return
  }
  func.func @transform_0(%arg0: i32, %arg1: i32) -> (i32, i32) {
    %c2_i32 = arith.constant 2 : i32
    %0 = arith.muli %arg0, %c2_i32 : i32
    %1 = arith.addi %0, %arg1 : i32
    %c0_i32 = arith.constant 0 : i32
    %c0_i32_0 = arith.constant 0 : i32
    return %1, %c0_i32 : i32, i32
  }
  func.func @transform_1(%arg0: i32, %arg1: i32) -> (i32, i32) {
    %c2_i32 = arith.constant 2 : i32
    %0 = arith.muli %arg0, %c2_i32 : i32
    %1 = arith.addi %0, %arg1 : i32
    %c0_i32 = arith.constant 0 : i32
    %c0_i32_0 = arith.constant 0 : i32
    return %c0_i32, %1 : i32, i32
  }
  func.func @transform_2(%arg0: i32, %arg1: i32) -> (i32, i32) {
    %c2_i32 = arith.constant 2 : i32
    %0 = arith.muli %arg0, %c2_i32 : i32
    %1 = arith.addi %0, %arg1 : i32
    %c0_i32 = arith.constant 0 : i32
    %c0_i32_0 = arith.constant 0 : i32
    return %1, %c0_i32 : i32, i32
  }
  func.func @transform_3(%arg0: i32, %arg1: i32) -> (i32, i32) {
    %c0_i32 = arith.constant 0 : i32
    %c0_i32_0 = arith.constant 0 : i32
    %c0_i32_1 = arith.constant 0 : i32
    return %c0_i32, %c0_i32_0 : i32, i32
  }
  func.func @transform_4(%arg0: i32, %arg1: i32) -> (i32, i32) {
    %c0_i32 = arith.constant 0 : i32
    %c0_i32_0 = arith.constant 0 : i32
    %c0_i32_1 = arith.constant 0 : i32
    return %c0_i32, %c0_i32_0 : i32, i32
  }
  func.func @transform_5(%arg0: i32, %arg1: i32) -> (i32, i32) {
    %c0_i32 = arith.constant 0 : i32
    %c0_i32_0 = arith.constant 0 : i32
    %c0_i32_1 = arith.constant 0 : i32
    return %c0_i32, %c0_i32_0 : i32, i32
  }
  func.func @transform_6(%arg0: i32, %arg1: i32) -> (i32, i32) {
    %c0_i32 = arith.constant 0 : i32
    %c0_i32_0 = arith.constant 0 : i32
    %c0_i32_1 = arith.constant 0 : i32
    return %c0_i32, %c0_i32_0 : i32, i32
  }
  func.func @transform_7(%arg0: i32, %arg1: i32) -> (i32, i32) {
    %c0_i32 = arith.constant 0 : i32
    %c0_i32_0 = arith.constant 0 : i32
    %c0_i32_1 = arith.constant 0 : i32
    return %c0_i32, %c0_i32_0 : i32, i32
  }
  func.func @transform_8(%arg0: i32, %arg1: i32) -> (i32, i32) {
    %c0_i32 = arith.constant 0 : i32
    %c0_i32_0 = arith.constant 0 : i32
    %c0_i32_1 = arith.constant 0 : i32
    return %c0_i32, %c0_i32_0 : i32, i32
  }
  func.func @transform_9(%arg0: i32, %arg1: i32) -> (i32, i32) {
    %c0_i32 = arith.constant 0 : i32
    %c0_i32_0 = arith.constant 0 : i32
    %c0_i32_1 = arith.constant 0 : i32
    return %c0_i32, %c0_i32_0 : i32, i32
  }
  func.func @transform_10(%arg0: i32, %arg1: i32) -> (i32, i32) {
    %c0_i32 = arith.constant 0 : i32
    %c0_i32_0 = arith.constant 0 : i32
    %c0_i32_1 = arith.constant 0 : i32
    return %c0_i32, %c0_i32_0 : i32, i32
  }
  func.func @transform_11(%arg0: i32, %arg1: i32) -> (i32, i32) {
    %c0_i32 = arith.constant 0 : i32
    %c0_i32_0 = arith.constant 0 : i32
    %c0_i32_1 = arith.constant 0 : i32
    return %c0_i32, %c0_i32_0 : i32, i32
  }
  func.func @transform_12(%arg0: i32, %arg1: i32) -> (i32, i32, i32) {
    %c0_i32 = arith.constant 0 : i32
    %c0_i32_0 = arith.constant 0 : i32
    %c0_i32_1 = arith.constant 0 : i32
    return %arg0, %c0_i32, %c0_i32_0 : i32, i32, i32
  }
  func.func @transform_13(%arg0: i32, %arg1: i32) -> (i32, i32, i32) {
    %c0_i32 = arith.constant 0 : i32
    %c0_i32_0 = arith.constant 0 : i32
    %c0_i32_1 = arith.constant 0 : i32
    return %arg0, %c0_i32, %c0_i32_0 : i32, i32, i32
  }
  func.func @transform_14(%arg0: i32, %arg1: i32) -> (i32, i32, i32) {
    %c0_i32 = arith.constant 0 : i32
    %c0_i32_0 = arith.constant 0 : i32
    %c0_i32_1 = arith.constant 0 : i32
    return %arg0, %c0_i32, %c0_i32_0 : i32, i32, i32
  }
}

</mosaic_0001>

<bundles_post_ra>
// kernel: tpu_custom_call.1
= control target key start
LH: loop header
LB: loop body
LE: loop exit
PB: predicated region body
PF: predicated region fallthrough
CT: control target
= control target key end

     0   :  { %s4988_s0 = inlined_call_operand.vmem [shape: s32[1024,1], index: 0, kind: input, shape index: {}]   ;;  %s4989_s1 = inlined_call_operand.vmem [shape: s32[1,1024], index: 1, kind: input, shape index: {}]   ;;  %s4990_s2 = inlined_call_operand.vmem [shape: bf16[1024,64], index: 2, kind: input, shape index: {}]   ;;  %s4991_s3 = inlined_call_operand.vmem [shape: bf16[64,256], index: 3, kind: input, shape index: {}]   ;;  %s4992_s4 = inlined_call_operand.vmem [shape: f32[1,256], index: 4, kind: input, shape index: {}]   ;;  %s4993_s5 = inlined_call_operand.vmem [shape: bf16[128,32], index: 5, kind: input, shape index: {}]   ;;  %s4994_s6 = inlined_call_operand.vmem [shape: f32[1,32], index: 6, kind: input, shape index: {}]   ;;  %s4995_s7 = inlined_call_operand.vmem [shape: bf16[128,128], index: 7, kind: input, shape index: {}]   ;;  %s4996_s8 = inlined_call_operand.vmem [shape: f32[1,128], index: 8, kind: input, shape index: {}]   ;;  %s4997_s9 = inlined_call_operand.vmem [shape: s32[1,32], index: 9, kind: input, shape index: {}]   ;;  %s4998_s10 = inlined_call_operand.vmem [shape: f32[8,32], index: 10, kind: input, shape index: {}]   ;;  %s4999_s11 = inlined_call_operand.vmem [shape: f32[32,128], index: 11, kind: input, shape index: {}]   ;;  %s5000_s12 = inlined_call_operand.hbm [shape: f32[2,1,32], index: 12, kind: output, shape index: {0}]   ;;  %s5001_s13 = inlined_call_operand.hbm [shape: f32[2,1,32], index: 13, kind: output, shape index: {1}]   ;;  %s5002_s14 = inlined_call_operand.hbm [shape: f32[2,8,128], index: 14, kind: output, shape index: {2}]  }
   0x1   :  { %5069 = sst [smem:[#allocation47_spill]] %s4988_s0 }
   0x2   :  { %5070 = sst [smem:[#allocation48_spill]] %s4989_s1 }
   0x3   :  { %5071 = sst [smem:[#allocation49_spill]] %s4990_s2 }
   0x4   :  { %5072 = sst [smem:[#allocation50_spill]] %s4998_s10 }
   0x5   :  { %5073 = sst [smem:[#allocation51_spill]] %s5000_s12 }
   0x6   :  { %5074 = sst [smem:[#allocation52_spill]] %s5001_s13 }
   0x7   :  { %5075 = sst [smem:[#allocation53_spill]] %s5002_s14 }
   0x8   :  { %20 = vsyncpa [#allocation3], 0 }
   0x9   :  { %22 = vsyncpa [#allocation3 + $0x1], 0 }
   0xa   :  { %23 = vsyncpa [#allocation5], 0 }
   0xb   :  { %25 = vsyncpa [#allocation5 + $0x1], 0  ;;  %s3607_s29 = smov 0   ;;  %s3609_s30 = smov 0  }
   0xc   :  { %s3611_s15 = smov 0   ;;  %s3613_s16 = smov 0  }
   0xd   :  { %s3615_s17 = smov 0   ;;  %s3617_s18 = smov 0  }
   0xe   :  { %s3619_s19 = smov 0   ;;  %s3621_s20 = smov 0  }
   0xf LB: > { %5076 = sst [smem:[#allocation9_spill]] %s3493_s29  ;;  %s5003_s21 = sadd.s32 4294967295, %s3521_s20   ;;  %s3521_s20 = sphi %s3621_s20, %s31_s20   ;;  %s3517_s19 = sphi %s3619_s19, %s5196_s19   ;;  %s3513_s18 = sphi %s3617_s18, %s5195_s18   ;;  %s3509_s17 = sphi %s3615_s17, %s5194_s17   ;;  %s3505_s16 = sphi %s3613_s16, %s5193_s16   ;;  %s3501_s15 = sphi %s3611_s15, %s5192_s15   ;;  %s3497_s30 = sphi %s3609_s30, %s5191_s30   ;;  %s3493_s29 = sphi %s3607_s29, %s5190_s29  }
  0x10   : > { %5077 = sst [smem:[#allocation10_spill]] %s3497_s30  ;;  %s5004_s22 = sadd.s32 4294967294, %s3521_s20  }
  0x11   : > { %5078 = sst [smem:[#allocation11_spill]] %s3501_s15  ;;  %s40_s23 = sadd.s32 1, %s3513_s18 }
  0x12   : > { %5079 = sst [smem:[#allocation12_spill]] %s3509_s17  ;;  %p41_p0 = scmp.ge.s32.totalorder %s40_s23, 2 }
  0x13   : > { %5080 = sst [smem:[#allocation13_spill]] %s3513_s18  ;;  %s43_s24 = sadd.s32 1, %s3517_s19 }
  0x14   : > { %5081 = sst [smem:[#allocation14_spill]] %s3517_s19  ;;  %p339_p1 = scmp.ne.s32.totalorder %s3501_s15, %s3497_s30 }
  0x15   : > { %p340_p2 = scmp.eq.s32.totalorder %s5003_s21, 3  ;;  %s5198_s23 = smov (%p41_p0, %s40_s23), 0 }
  0x16   : > { %5082 = sst [smem:[#allocation15_spill]] %s5198_s23  ;;  %s5200_s24 = smov (!%p41_p0, %s43_s24), %s3517_s19 }
  0x17   : > { %p3658_p3 = por %p340_p2, %p339_p1  ;;  %p345_p4 = scmp.ne.s32.totalorder %s3497_s30, %s3493_s29 }
  0x18   : > { %p45_p5 = scmp.ge.s32.totalorder %s5200_s24, 2  ;;  %p346_p6 = scmp.eq.s32.totalorder %s5004_s22, 3 }
  0x19   : > { %s5083_s25 = scalar_select %p3658_p3, 1, 0 }
  0x1a   : > { %p2772_p7 = scmp.ge.s32.totalorder %s3521_s20, 1  ;;  %p481_p8 = scmp.lt.s32.totalorder %s3521_s20, 5 }
  0x1b   : > { %5084 = sst [smem:[#allocation16_spill]] %s5083_s25  ;;  %s5202_s24 = smov (%p45_p5, %s5200_s24), 0 }
  0x1c   : > { %5085 = sst [smem:[#allocation17_spill]] %s5202_s24  ;;  %p3670_p9 = por %p346_p6, %p345_p4 }
  0x1d   : > { %p482_p10 = pnand %p2772_p7, %p481_p8  ;;  %s326_s27 = ssub.s32 %s3517_s19, %s5202_s24 }
  0x1e   : > { %s5086_s26 = scalar_select %p3670_p9, 1, 0 }
  0x1f   : > { %s329_s28 = sadd.s32 1, %s3501_s15  ;;  %p327_p11 = scmp.eq.s32.totalorder %s326_s27, 0 }
  0x20   : > { %5087 = sst [smem:[#allocation18_spill]] %s5086_s26  ;;  %485 = sbr.rel (%p482_p10) target bundleno = 1148 (0x47c), region = 68 }
  0x21   : > { %s3678_s21 = scalar_select %p327_p11, %s3501_s15, %s329_s28  }
  0x23   : > { %5088 = sst [smem:[#allocation19_spill]] %s3678_s21 }
  0x25   : > { %s3681_s22 = sand.u32 1, %s3497_s30   ;;  %s2774_s23 = sshll.u32 %s3509_s17, 1 }
  0x26   : > { %s2773_s18 = sshll.u32 %s3681_s22, 3  ;;  %s551_s29 = sadd.s32 %s3505_s16, %s2774_s23 }
  0x27   : > { %s2775_s14 = sshll.u32 %s551_s29, 5  ;;  %s2778_s26 = sshll.u32 %s551_s29, 1 }
  0x28   : > { %p553_p12 = scmp.lt.s32.totalorder %s2775_s14, 127  ;;  %p563_p13 = scmp.lt.s32.totalorder %s2778_s26, 7 }
  0x29   : > { %s5089_s0 = sld [smem:[#allocation47_spill]]  ;;  %s3703_s25 = scalar_lea.vmem [#allocation2], %s3681_s22 }
  0x2a   : > { %s5204_s14 = smov (!%p553_p12, %s2775_s14), 127  ;;  %s5206_s26 = smov (!%p563_p13, %s2778_s26), 7 }
  0x2b   : > { %s2776_s27 = sshll.u32 %s5204_s14, 3  ;;  %s2781_s28 = sshll.u32 %s5204_s14, 2 }
  0x2c   : > { %s5090_s1 = sld [smem:[#allocation48_spill]]  ;;  %s3706_s10 = scalar_lea.vmem [#allocation4], %s3681_s22 }
  0x2d   : > { %s5091_s2 = sld [smem:[#allocation49_spill]]  ;;  %s3708_s17 = scalar_lea.vmem [#allocation6], %s2773_s18 }
  0x2e   : > { %p2782_p0 = scmp.ne.s32.totalorder %s3505_s16, 0 }
  0x2f   : > { %s3691_s21 = scalar_lea.vmem %s5089_s0, %s2776_s27 }
  0x30   : > { %583 = sbr.rel (%p2782_p0) target bundleno = 56 (0x38), region = 72 }
  0x32   : > { %s565_s12 = scalar_lea.vmem %s5090_s1, %s5206_s26 }
  0x33   : > { %s3700_s29 = scalar_lea.vmem %s5091_s2, %s2781_s28 }
  0x35   : > { %vm584_vm0 = vcmask 253952   ;;  %v3523_v0 = vmov -1e+30   ;;  %v3524_v1 = vmov 0.0  }
  0x36   : > { %585 = vst.msk [vmem:[%s3703_s25] sm:$0x1] %vm584_vm0, %v3523_v0  ;;  %586 = vst.msk [vmem:[%s3706_s10] sm:$0x1] %vm584_vm0, %v3524_v1 }
  0x37   : > { %587 = vst [vmem:[%s3708_s17] sm:$0xff] %v3524_v1 }
  0x38 PF: > { %v3259_v2 = vld [vmem:[%s4991_s3 + $0x34] ss:$8 sps:$4 sm:$0xff]   ;;  %v3261_v3 = vld [vmem:[%s4991_s3 + $0x30] ss:$8 sps:$4 sm:$0xff]   ;;  %v3525_v4 = vmov 0   ;;  %v3271_v11 = vld [vmem:[%s3700_s29] sm:$0xff]   ;;  %v753_v52 = vlaneseq }
  0x39   : > { %1021 = vmatprep.mubr.bf16.mxu0 %v3525_v4  ;;  %3258 = vset.pattern.permute.xlu1 %v3525_v4  ;;  %v3262_v5 = vld [vmem:[%s4991_s3 + $0x24] ss:$8 sps:$4 sm:$0xff]   ;;  %v3264_v6 = vld [vmem:[%s4991_s3 + $0x20] ss:$8 sps:$4 sm:$0xff]   ;;  %v3265_v7 = vld [vmem:[%s4991_s3 + $0x14] ss:$8 sps:$4 sm:$0xff]  }
  0x3a   : > { %997 = vmatprep.subr.bf16.mxu0 %v3259_v2  ;;  %3257 = vset.pattern.permute.xlu0 %v3525_v4  ;;  %v3267_v8 = vld [vmem:[%s4991_s3 + $0x10] ss:$8 sps:$4 sm:$0xff]   ;;  %v3268_v9 = vld [vmem:[%s4991_s3 + $0x4] ss:$8 sps:$4 sm:$0xff]   ;;  %v3270_v10 = vld [vmem:[%s4991_s3] ss:$8 sps:$4 sm:$0xff]  }
  0x3b   : > { %998 = vmatpush1.bf16.msra.mxu0 %v3261_v3  ;;  %vm940_vm1 = vcmask 523264   ;;  %v3272_v12 = vld [vmem:[%s3700_s29 + $0x8] sm:$0xff]   ;;  %v3287_v13 = vld [vmem:[%s4993_s5 + $0x38] sm:$0xff]   ;;  %v3288_v14 = vld [vmem:[%s4993_s5 + $0x30] sm:$0xff]   ;;  %v3836_v55 = vshrl.u32 %v753_v52, 7  ;;  %vm1774_vm4 = vcmask 261120  }
  0x3c   : > { %999 = vmatprep.subr.bf16.mxu0 %v3262_v5  ;;  %3007 = vmatprep.subr.bf16.mxu1 %v3287_v13  ;;  %v3289_v15 = vld [vmem:[%s4993_s5 + $0x28] sm:$0xff]   ;;  %v3273_v16 = vld [vmem:[%s3700_s29 + $0x10] sm:$0xff]   ;;  %v3290_v17 = vld [vmem:[%s4993_s5 + $0x20] sm:$0xff]   ;;  %s5184_s24 = sld [smem:[#allocation52_spill]]  ;;  %s2605_s28 = sshll.u32 %s3706_s10, 4  ;;  %s2606_s28 = int_to_ptr.vmem [resolvable:$true] %s2605_s28 }
  0x3d   : > { %3008 = vmatpush3.bf16.msra.mxu1 %v3287_v13  ;;  %v3274_v18 = vld [vmem:[%s3700_s29 + $0x18] sm:$0xff]   ;;  %v3275_v19 = vld [vmem:[%s3700_s29 + $0x20] sm:$0xff]   ;;  %v3276_v20 = vld [vmem:[%s3700_s29 + $0x28] sm:$0xff]   ;;  %5092 = vst [vmem:[#allocation20_spill] sm:$0xff] %v3836_v55  ;;  %v3841_v58 = vsub.s32 0, %v3836_v55  ;;  %v5020_v59 = vsub.s32 1, %v3836_v55 }
  0x3e   : > { %3009 = vmatprep.subr.bf16.mxu1 %v3288_v14  ;;  %v3277_v21 = vld [vmem:[%s3700_s29 + $0x30] sm:$0xff]   ;;  %v3278_v22 = vld [vmem:[%s3700_s29 + $0x38] sm:$0xff]   ;;  %v3279_v23 = vld [vmem:[%s3700_s29 + $0x40] sm:$0xff]   ;;  %s5185_s13 = sld [smem:[#allocation51_spill]]  ;;  %s3373_s0 = scalar_lea.vmem %s2606_s28, 16 }
  0x3f   : > { %1000 = vmatpush1.bf16.msra.mxu0 %v3264_v6  ;;  %v3291_v24 = vld [vmem:[%s4993_s5 + $0x18] sm:$0xff]   ;;  %v3280_v25 = vld [vmem:[%s3700_s29 + $0x48] sm:$0xff]   ;;  %v3292_v26 = vld [vmem:[%s4993_s5 + $0x10] sm:$0xff]   ;;  %p3374_p1 = scmp.ne.s32.totalorder %s2606_s28, %s3373_s0 }
  0x40   : > { %1001 = vmatprep.subr.bf16.mxu0 %v3265_v7  ;;  %v3293_v27 = vld [vmem:[%s4993_s5 + $0x8] sm:$0xff]   ;;  %v3281_v28 = vld [vmem:[%s3700_s29 + $0x50] sm:$0xff]   ;;  %v3294_v29 = vld [vmem:[%s4993_s5] sm:$0xff]  }
  0x41   : > { %3010 = vmatpush3.bf16.msra.mxu1 %v3288_v14  ;;  %v3282_v30 = vld [vmem:[%s3700_s29 + $0x58] sm:$0xff]   ;;  %v3283_v31 = vld [vmem:[%s3700_s29 + $0x60] sm:$0xff]   ;;  %v3284_v32 = vld [vmem:[%s3700_s29 + $0x68] sm:$0xff]   ;;  %p3375_p2 = pnand %p3374_p1, %p3658_p3 }
  0x42   : > { %3011 = vmatprep.subr.bf16.mxu1 %v3289_v15  ;;  %v3285_v33 = vld [vmem:[%s3700_s29 + $0x70] sm:$0xff]   ;;  %v3286_v34 = vld [vmem:[%s3700_s29 + $0x78] sm:$0xff]   ;;  %v588_v36 = vld [vmem:[%s3691_s21] sm:$0xff]  ;;  %s5181_s29 = sld [smem:[#allocation50_spill]] }
  0x43   : > { %1002 = vmatpush1.bf16.msra.mxu0 %v3267_v8  ;;  %v590_v35 = vld [vmem:[%s3691_s21 + $0x10] sm:$0xff]  ;;  %622 = vperm.xlu0 %3257, %v588_v36   ;;  %v591_v37 = vld [vmem:[%s3691_s21 + $0x18] sm:$0xff]  ;;  %v589_v38 = vld [vmem:[%s3691_s21 + $0x8] sm:$0xff]  ;;  %p3376_p4 = pneg %p3375_p2 }
  0x44   : > { %1003 = vmatprep.subr.bf16.mxu0 %v3268_v9  ;;  %628 = vperm.xlu1 %3258, %v590_v35   ;;  %v593_v39 = vld [vmem:[%s3691_s21 + $0x28] sm:$0xff]  ;;  %v592_v40 = vld [vmem:[%s3691_s21 + $0x20] sm:$0xff]  ;;  %v595_v41 = vld [vmem:[%s3691_s21 + $0x38] sm:$0xff] }
  0x45   : > { %3012 = vmatpush3.bf16.msra.mxu1 %v3289_v15  ;;  %v594_v42 = vld [vmem:[%s3691_s21 + $0x30] sm:$0xff]  ;;  %v597_v43 = vld [vmem:[%s3691_s21 + $0x48] sm:$0xff]  ;;  %v596_v44 = vld [vmem:[%s3691_s21 + $0x40] sm:$0xff] }
  0x46   : > { %3013 = vmatprep.subr.bf16.mxu1 %v3290_v17  ;;  %v3825_v45 = vld [vmem:[%s4995_s7 + $0x38] sm:$0xff]   ;;  %v598_v47 = vld [vmem:[%s3691_s21 + $0x50] sm:$0xff]  ;;  %v601_v48 = vld [vmem:[%s3691_s21 + $0x68] sm:$0xff] }
  0x47   : > { %1004 = vmatpush1.bf16.msra.mxu0 %v3270_v10  ;;  %625 = vperm.xlu0 %3257, %v589_v38   ;;  %v599_v46 = vld [vmem:[%s3691_s21 + $0x58] sm:$0xff]  ;;  %v600_v49 = vld [vmem:[%s3691_s21 + $0x60] sm:$0xff]  ;;  %v602_v51 = vld [vmem:[%s3691_s21 + $0x70] sm:$0xff] }
  0x48   : > { %631 = vperm.xlu1 %3258, %v591_v37   ;;  %v603_v50 = vld [vmem:[%s3691_s21 + $0x78] sm:$0xff]  ;;  %v605_v53 = vld [vmem:[%s3691_s21 + $0x88] sm:$0xff]  ;;  %v604_v54 = vld [vmem:[%s3691_s21 + $0x80] sm:$0xff] }
  0x49   : > { %3014 = vmatpush3.bf16.msra.mxu1 %v3290_v17  ;;  %v607_v56 = vld [vmem:[%s3691_s21 + $0x98] sm:$0xff]  ;;  %v606_v57 = vld [vmem:[%s3691_s21 + $0x90] sm:$0xff]  ;;  %v808_v60 = vld [vmem:[%s4992_s4] sm:$0x3] }
  0x4a   : > { %2808 = vmatmul.mubr.msk.bf16.vlgmr.msra.gmra.mxu0 %vm940_vm1, %v3271_v11  ;;  %3015 = vmatprep.subr.bf16.mxu1 %v3291_v24  ;;  %v609_v61 = vld [vmem:[%s3691_s21 + $0xa8] sm:$0xff]  ;;  %v608_v62 = vld [vmem:[%s3691_s21 + $0xa0] sm:$0xff]  ;;  %v3850_v63 = vrot.slane %v808_v60, %v3841_v58  ;;  %v3854_v0 = vrot.slane %v808_v60, %v5020_v59  ;;  %v611_v3 = vld [vmem:[%s3691_s21 + $0xb8] sm:$0xff] }
  0x4b   : > { %1031 = vmatprep.mubr.bf16.mxu0 %v3525_v4  ;;  %634 = vperm.xlu0 %3257, %v592_v40   ;;  %v613_v8 = vld [vmem:[%s3691_s21 + $0xc8] sm:$0xff]  ;;  %v612_v10 = vld [vmem:[%s3691_s21 + $0xc0] sm:$0xff]  ;;  %v3296_v37 = vld [vmem:[%s4995_s7 + $0x30] sm:$0xff]  }
  0x4c   : > { %637 = vperm.xlu1 %3258, %v593_v39   ;;  %v619_v39 = vld [vmem:[%s3691_s21 + $0xf8] sm:$0xff]  ;;  %v618_v40 = vld [vmem:[%s3691_s21 + $0xf0] sm:$0xff] }
  0x4d   : > { %3016 = vmatpush3.bf16.msra.mxu1 %v3291_v24 }
  0x4e   : > { %3017 = vmatprep.subr.bf16.mxu1 %v3292_v26 }
  0x4f   : > { %640 = vperm.xlu0 %3257, %v594_v42  }
  0x50   : > { %643 = vperm.xlu1 %3258, %v595_v41  }
  0x51   : > { %3018 = vmatpush3.bf16.msra.mxu1 %v3292_v26  ;;  %v617_v26 = vld [vmem:[%s3691_s21 + $0xe8] sm:$0xff] }
  0x52   : > { %2809 = vmatmul.mubr.msk.bf16.gmra.mxu0 %vm940_vm1, %v3272_v12  ;;  %3019 = vmatprep.subr.bf16.mxu1 %v3293_v27 }
  0x53   : > { %1041 = vmatprep.mubr.bf16.mxu0 %v3525_v4  ;;  %646 = vperm.xlu0 %3257, %v596_v44  }
  0x54   : > { %649 = vperm.xlu1 %3258, %v597_v43  }
  0x55   : > { %3020 = vmatpush3.bf16.msra.mxu1 %v3293_v27 }
  0x56   : > { %3021 = vmatprep.subr.bf16.mxu1 %v3294_v29 }
  0x57   : > { %652 = vperm.xlu0 %3257, %v598_v47   ;;  %v3297_v47 = vld [vmem:[%s4995_s7 + $0x28] sm:$0xff]  }
  0x58   : > { %655 = vperm.xlu1 %3258, %v599_v46  }
  0x59   : > { %3022 = vmatpush3.bf16.msra.mxu1 %v3294_v29 }
  0x5a   : > { %2810 = vmatmul.mubr.msk.bf16.gmra.mxu0 %vm940_vm1, %v3273_v16  ;;  %3055 = vmatprep.subr.bf16.mxu1 %v3825_v45 }
  0x5b   : > { %1051 = vmatprep.mubr.bf16.mxu0 %v3525_v4  ;;  %658 = vperm.xlu0 %3257, %v600_v49  }
  0x5c   : > { %661 = vperm.xlu1 %3258, %v601_v48  }
  0x5f   : > { %664 = vperm.xlu0 %3257, %v602_v51  }
  0x60   : > { %667 = vperm.xlu1 %3258, %v603_v50  }
  0x62   : > { %2811 = vmatmul.mubr.msk.bf16.gmra.mxu0 %vm940_vm1, %v3274_v18 }
  0x63   : > { %1061 = vmatprep.mubr.bf16.mxu0 %v3525_v4  ;;  %670 = vperm.xlu0 %3257, %v604_v54  }
  0x64   : > { %673 = vperm.xlu1 %3258, %v605_v53  }
  0x67   : > { %676 = vperm.xlu0 %3257, %v606_v57  }
  0x68   : > { %679 = vperm.xlu1 %3258, %v607_v56  }
  0x6a   : > { %2812 = vmatmul.mubr.msk.bf16.gmra.mxu0 %vm940_vm1, %v3275_v19 }
  0x6b   : > { %1071 = vmatprep.mubr.bf16.mxu0 %v3525_v4  ;;  %682 = vperm.xlu0 %3257, %v608_v62  }
  0x6c   : > { %685 = vperm.xlu1 %3258, %v609_v61  }
  0x70   : > { %691 = vperm.xlu1 %3258, %v611_v3   ;;  %v3299_v3 = vld [vmem:[%s4995_s7 + $0x18] sm:$0xff]  }
  0x72   : > { %2813 = vmatmul.mubr.msk.bf16.gmra.mxu0 %vm940_vm1, %v3276_v20  ;;  %v615_v20 = vld [vmem:[%s3691_s21 + $0xd8] sm:$0xff] }
  0x73   : > { %1081 = vmatprep.mubr.bf16.mxu0 %v3525_v4 }
  0x74   : > { %697 = vperm.xlu1 %3258, %v613_v8  }
  0x78   : > { %703 = vperm.xlu1 %3258, %v615_v20  }
  0x7a   : > { %2814 = vmatmul.mubr.msk.bf16.gmra.mxu0 %vm940_vm1, %v3277_v21  ;;  %v614_v21 = vld [vmem:[%s3691_s21 + $0xd0] sm:$0xff] }
  0x7b   : > { %1091 = vmatprep.mubr.bf16.mxu0 %v3525_v4 }
  0x7c   : > { %709 = vperm.xlu1 %3258, %v617_v26  }
  0x80   : > { %715 = vperm.xlu1 %3258, %v619_v39  }
  0x82   : > { %2815 = vmatmul.mubr.msk.bf16.gmra.mxu0 %vm940_vm1, %v3278_v22 }
  0x83   : > { %1101 = vmatprep.mubr.bf16.mxu0 %v3525_v4 }
  0x8a   : > { %2816 = vmatmul.mubr.msk.bf16.gmra.mxu0 %vm940_vm1, %v3279_v23 }
  0x8b   : > { %1111 = vmatprep.mubr.bf16.mxu0 %v3525_v4 }
  0x92   : > { %2817 = vmatmul.mubr.msk.bf16.gmra.mxu0 %vm940_vm1, %v3280_v25 }
  0x93   : > { %1121 = vmatprep.mubr.bf16.mxu0 %v3525_v4 }
  0x9a   : > { %2818 = vmatmul.mubr.msk.bf16.gmra.mxu0 %vm940_vm1, %v3281_v28  ;;  %v616_v28 = vld [vmem:[%s3691_s21 + $0xe0] sm:$0xff] }
  0x9b   : > { %1131 = vmatprep.mubr.bf16.mxu0 %v3525_v4 }
  0xa2   : > { %2819 = vmatmul.mubr.msk.bf16.gmra.mxu0 %vm940_vm1, %v3282_v30 }
  0xa3   : > { %1141 = vmatprep.mubr.bf16.mxu0 %v3525_v4 }
  0xaa   : > { %2820 = vmatmul.mubr.msk.bf16.gmra.mxu0 %vm940_vm1, %v3283_v31 }
  0xab   : > { %1151 = vmatprep.mubr.bf16.mxu0 %v3525_v4 }
  0xb2   : > { %2821 = vmatmul.mubr.msk.bf16.gmra.mxu0 %vm940_vm1, %v3284_v32 }
  0xb3   : > { %1161 = vmatprep.mubr.bf16.mxu0 %v3525_v4 }
  0xba   : > { %2822 = vmatmul.mubr.msk.bf16.gmra.mxu0 %vm940_vm1, %v3285_v33 }
  0xbb   : > { %1171 = vmatprep.mubr.bf16.mxu0 %v3525_v4  ;;  %v610_v4 = vld [vmem:[%s3691_s21 + $0xb0] sm:$0xff]  ;;  %s5179_s21 = sld [smem:[#allocation12_spill]] }
  0xbc   : > { %688 = vperm.xlu0 %3257, %v610_v4  }
  0xc0   : > { %694 = vperm.xlu0 %3257, %v612_v10  }
  0xc1   : > { %s2878_s16 = sshll.u32 %s5179_s21, 4 }
  0xc2   : > { %2823 = vmatmul.mubr.msk.bf16.gmra.mxu0 %vm940_vm1, %v3286_v34  ;;  %s4892_s27 = scalar_lea.hbm %s5184_s24, %s2878_s16  ;;  %s4898_s30 = scalar_lea.hbm %s5185_s13, %s2878_s16 }
  0xc4   : > { %700 = vperm.xlu0 %3257, %v614_v21  }
  0xc8   : > { %706 = vperm.xlu0 %3257, %v616_v28  }
  0xcc   : > { %712 = vperm.xlu0 %3257, %v618_v40  }
 0x10a   : > { %v1023_v1 = vpop.f32.mrf.mxu0 }
 0x10b   : > { %v1024_v5 = vadd.f32 %v1023_v1, %v3850_v63 }
 0x10c   : > { %v1025_v2 = vpop.f32.mrf.mxu0 }
 0x10d   : > { %v1026_v6 = vadd.f32 %v1025_v2, %v3854_v0  ;;  %v1182_v12 = vmax.f32 %v1024_v5, 0.0 }
 0x10e   : > { %v1027_v7 = vpop.f32.mrf.mxu0 }
 0x10f   : > { %v1028_v9 = vadd.f32 %v1027_v7, %v3850_v63  ;;  %v1183_v16 = vmax.f32 %v1026_v6, 0.0 }
 0x110   : > { %v1029_v11 = vpop.f32.mrf.mxu0 }
 0x111   : > { %v1184_v13 = vmax.f32 %v1028_v9, 0.0  ;;  %v1030_v14 = vadd.f32 %v1029_v11, %v3854_v0 }
 0x112   : > { %v1033_v15 = vpop.f32.mrf.mxu0 }
 0x113   : > { %v1185_v17 = vmax.f32 %v1030_v14, 0.0  ;;  %v1246_v18 = vpack.c.bf16 %v1184_v13, %v1182_v12  ;;  %v1034_v23 = vadd.f32 %v1033_v15, %v3850_v63  ;;  %v3300_v12 = vld [vmem:[%s4995_s7 + $0x10] sm:$0xff]  }
 0x114   : > { %v1035_v19 = vpop.f32.mrf.mxu0 }
 0x115   : > { %v3866_v22 = vpack.c.bf16 %v1185_v17, %v1183_v16  ;;  %v1036_v24 = vadd.f32 %v1035_v19, %v3854_v0  ;;  %3023 = vmatprep.mubr.bf16.mxu1 %v1246_v18  ;;  %v1186_v30 = vmax.f32 %v1034_v23, 0.0  ;;  %v3301_v19 = vld [vmem:[%s4995_s7 + $0x8] sm:$0xff]  }
 0x116   : > { %v1037_v25 = vpop.f32.mrf.mxu0 }
 0x117   : > { %v1038_v27 = vadd.f32 %v1037_v25, %v3850_v63  ;;  %v1187_v34 = vmax.f32 %v1036_v24, 0.0 }
 0x118   : > { %v1039_v29 = vpop.f32.mrf.mxu0 }
 0x119   : > { %v1188_v31 = vmax.f32 %v1038_v27, 0.0  ;;  %v1040_v32 = vadd.f32 %v1039_v29, %v3854_v0  ;;  %v3302_v29 = vld [vmem:[%s4995_s7] sm:$0xff]  }
 0x11a   : > { %v1043_v33 = vpop.f32.mrf.mxu0 }
 0x11b   : > { %v1247_v35 = vpack.c.bf16 %v1188_v31, %v1186_v30  ;;  %v1189_v36 = vmax.f32 %v1040_v32, 0.0  ;;  %v1044_v42 = vadd.f32 %v1043_v33, %v3850_v63 }
 0x11c   : > { %v1045_v38 = vpop.f32.mrf.mxu0 }
 0x11d   : > { %v3879_v41 = vpack.c.bf16 %v1189_v36, %v1187_v34  ;;  %v1046_v43 = vadd.f32 %v1045_v38, %v3854_v0  ;;  %3024 = vmatmul.mubr.bf16.vlgmr.msra.gmra.mxu1 %v1247_v35  ;;  %v1190_v49 = vmax.f32 %v1044_v42, 0.0 }
 0x11e   : > { %v1047_v44 = vpop.f32.mrf.mxu0  ;;  %3056 = vmatpush3.bf16.msra.mxu1 %v3825_v45  ;;  %v3298_v45 = vld [vmem:[%s4995_s7 + $0x20] sm:$0xff]  }
 0x11f   : > { %v1048_v46 = vadd.f32 %v1047_v44, %v3850_v63  ;;  %3057 = vmatprep.subr.bf16.mxu1 %v3296_v37  ;;  %v1191_v53 = vmax.f32 %v1046_v43, 0.0 }
 0x120   : > { %v1049_v48 = vpop.f32.mrf.mxu0 }
 0x121   : > { %v1192_v50 = vmax.f32 %v1048_v46, 0.0  ;;  %v1050_v51 = vadd.f32 %v1049_v48, %v3854_v0 }
 0x122   : > { %v1053_v52 = vpop.f32.mrf.mxu0  ;;  %3058 = vmatpush3.bf16.msra.mxu1 %v3296_v37 }
 0x123   : > { %v1248_v54 = vpack.c.bf16 %v1192_v50, %v1190_v49  ;;  %v1193_v56 = vmax.f32 %v1050_v51, 0.0  ;;  %3059 = vmatprep.subr.bf16.mxu1 %v3297_v47  ;;  %v1054_v61 = vadd.f32 %v1053_v52, %v3850_v63 }
 0x124   : > { %v1055_v57 = vpop.f32.mrf.mxu0 }
 0x125   : > { %v3892_v60 = vpack.c.bf16 %v1193_v56, %v1191_v53  ;;  %v1056_v62 = vadd.f32 %v1055_v57, %v3854_v0  ;;  %3027 = vmatprep.mubr.bf16.mxu1 %v1248_v54  ;;  %v1194_v5 = vmax.f32 %v1054_v61, 0.0 }
 0x126   : > { %v1057_v1 = vpop.f32.mrf.mxu0  ;;  %3060 = vmatpush3.bf16.msra.mxu1 %v3297_v47 }
 0x127   : > { %v1058_v2 = vadd.f32 %v1057_v1, %v3850_v63  ;;  %3061 = vmatprep.subr.bf16.mxu1 %v3298_v45  ;;  %v1195_v9 = vmax.f32 %v1056_v62, 0.0 }
 0x128   : > { %v1059_v4 = vpop.f32.mrf.mxu0 }
 0x129   : > { %v1196_v6 = vmax.f32 %v1058_v2, 0.0  ;;  %v1060_v7 = vadd.f32 %v1059_v4, %v3854_v0 }
 0x12a   : > { %v1063_v8 = vpop.f32.mrf.mxu0  ;;  %3062 = vmatpush3.bf16.msra.mxu1 %v3298_v45 }
 0x12b   : > { %v1249_v10 = vpack.c.bf16 %v1196_v6, %v1194_v5  ;;  %v1197_v11 = vmax.f32 %v1060_v7, 0.0  ;;  %3063 = vmatprep.subr.bf16.mxu1 %v3299_v3  ;;  %v1064_v15 = vadd.f32 %v1063_v8, %v3850_v63 }
 0x12c   : > { %v1065_v13 = vpop.f32.mrf.mxu0 }
 0x12d   : > { %v3904_v14 = vpack.c.bf16 %v1197_v11, %v1195_v9  ;;  %v1066_v16 = vadd.f32 %v1065_v13, %v3854_v0  ;;  %3028 = vmatmul.mubr.bf16.gmra.mxu1 %v1249_v10  ;;  %v1198_v21 = vmax.f32 %v1064_v15, 0.0 }
 0x12e   : > { %v1067_v17 = vpop.f32.mrf.mxu0  ;;  %3064 = vmatpush3.bf16.msra.mxu1 %v3299_v3 }
 0x12f   : > { %v1068_v18 = vadd.f32 %v1067_v17, %v3850_v63  ;;  %3065 = vmatprep.subr.bf16.mxu1 %v3300_v12  ;;  %v1199_v26 = vmax.f32 %v1066_v16, 0.0 }
 0x130   : > { %v1069_v20 = vpop.f32.mrf.mxu0 }
 0x131   : > { %v1200_v23 = vmax.f32 %v1068_v18, 0.0  ;;  %v1070_v24 = vadd.f32 %v1069_v20, %v3854_v0 }
 0x132   : > { %v1073_v25 = vpop.f32.mrf.mxu0  ;;  %3066 = vmatpush3.bf16.msra.mxu1 %v3300_v12 }
 0x133   : > { %v1250_v27 = vpack.c.bf16 %v1200_v23, %v1198_v21  ;;  %v1201_v28 = vmax.f32 %v1070_v24, 0.0  ;;  %3067 = vmatprep.subr.bf16.mxu1 %v3301_v19  ;;  %v1074_v32 = vadd.f32 %v1073_v25, %v3850_v63 }
 0x134   : > { %v1075_v30 = vpop.f32.mrf.mxu0 }
 0x135   : > { %v3916_v31 = vpack.c.bf16 %v1201_v28, %v1199_v26  ;;  %v1076_v33 = vadd.f32 %v1075_v30, %v3854_v0  ;;  %3031 = vmatprep.mubr.bf16.mxu1 %v1250_v27  ;;  %v1202_v37 = vmax.f32 %v1074_v32, 0.0 }
 0x136   : > { %v1077_v34 = vpop.f32.mrf.mxu0  ;;  %3068 = vmatpush3.bf16.msra.mxu1 %v3301_v19 }
 0x137   : > { %v1078_v35 = vadd.f32 %v1077_v34, %v3850_v63  ;;  %3069 = vmatprep.subr.bf16.mxu1 %v3302_v29  ;;  %v1203_v42 = vmax.f32 %v1076_v33, 0.0 }
 0x138   : > { %v1079_v36 = vpop.f32.mrf.mxu0 }
 0x139   : > { %v1204_v38 = vmax.f32 %v1078_v35, 0.0  ;;  %v1080_v39 = vadd.f32 %v1079_v36, %v3854_v0 }
 0x13a   : > { %v1083_v40 = vpop.f32.mrf.mxu0  ;;  %3070 = vmatpush3.bf16.msra.mxu1 %v3302_v29 }
 0x13b   : > { %v1251_v43 = vpack.c.bf16 %v1204_v38, %v1202_v37  ;;  %v1205_v44 = vmax.f32 %v1080_v39, 0.0  ;;  %v1084_v48 = vadd.f32 %v1083_v40, %v3850_v63 }
 0x13c   : > { %v1085_v46 = vpop.f32.mrf.mxu0 }
 0x13d   : > { %v3922_v47 = vpack.c.bf16 %v1205_v44, %v1203_v42  ;;  %v1086_v49 = vadd.f32 %v1085_v46, %v3854_v0  ;;  %3032 = vmatmul.mubr.bf16.gmra.mxu1 %v1251_v43  ;;  %v1206_v53 = vmax.f32 %v1084_v48, 0.0 }
 0x13e   : > { %v1087_v50 = vpop.f32.mrf.mxu0 }
 0x13f   : > { %v1088_v51 = vadd.f32 %v1087_v50, %v3850_v63  ;;  %v1207_v57 = vmax.f32 %v1086_v49, 0.0 }
 0x140   : > { %v1089_v52 = vpop.f32.mrf.mxu0 }
 0x141   : > { %v1208_v54 = vmax.f32 %v1088_v51, 0.0  ;;  %v1090_v56 = vadd.f32 %v1089_v52, %v3854_v0 }
 0x142   : > { %v1093_v45 = vpop.f32.mrf.mxu0 }
 0x143   : > { %v1252_v61 = vpack.c.bf16 %v1208_v54, %v1206_v53  ;;  %v1209_v62 = vmax.f32 %v1090_v56, 0.0  ;;  %v1094_v3 = vadd.f32 %v1093_v45, %v3850_v63 }
 0x144   : > { %v1095_v1 = vpop.f32.mrf.mxu0 }
 0x145   : > { %v3928_v2 = vpack.c.bf16 %v1209_v62, %v1207_v57  ;;  %v1096_v4 = vadd.f32 %v1095_v1, %v3854_v0  ;;  %3035 = vmatprep.mubr.bf16.mxu1 %v1252_v61  ;;  %v1210_v8 = vmax.f32 %v1094_v3, 0.0 }
 0x146   : > { %v1097_v5 = vpop.f32.mrf.mxu0 }
 0x147   : > { %v1098_v6 = vadd.f32 %v1097_v5, %v3850_v63  ;;  %v1211_v12 = vmax.f32 %v1096_v4, 0.0 }
 0x148   : > { %v1099_v7 = vpop.f32.mrf.mxu0 }
 0x149   : > { %v1212_v9 = vmax.f32 %v1098_v6, 0.0  ;;  %v1100_v10 = vadd.f32 %v1099_v7, %v3854_v0 }
 0x14a   : > { %v1103_v11 = vpop.f32.mrf.mxu0 }
 0x14b   : > { %v1253_v13 = vpack.c.bf16 %v1212_v9, %v1210_v8  ;;  %v1213_v15 = vmax.f32 %v1100_v10, 0.0  ;;  %v1104_v18 = vadd.f32 %v1103_v11, %v3850_v63 }
 0x14c   : > { %v1105_v16 = vpop.f32.mrf.mxu0 }
 0x14d   : > { %v3934_v17 = vpack.c.bf16 %v1213_v15, %v1211_v12  ;;  %v1106_v19 = vadd.f32 %v1105_v16, %v3854_v0  ;;  %3036 = vmatmul.mubr.bf16.gmra.mxu1 %v1253_v13  ;;  %v1214_v24 = vmax.f32 %v1104_v18, 0.0 }
 0x14e   : > { %v1107_v20 = vpop.f32.mrf.mxu0 }
 0x14f   : > { %v1108_v21 = vadd.f32 %v1107_v20, %v3850_v63  ;;  %v1215_v28 = vmax.f32 %v1106_v19, 0.0 }
 0x150   : > { %v1109_v23 = vpop.f32.mrf.mxu0 }
 0x151   : > { %v1216_v25 = vmax.f32 %v1108_v21, 0.0  ;;  %v1110_v26 = vadd.f32 %v1109_v23, %v3854_v0 }
 0x152   : > { %v1113_v27 = vpop.f32.mrf.mxu0 }
 0x153   : > { %v1254_v29 = vpack.c.bf16 %v1216_v25, %v1214_v24  ;;  %v1217_v30 = vmax.f32 %v1110_v26, 0.0  ;;  %v1114_v34 = vadd.f32 %v1113_v27, %v3850_v63 }
 0x154   : > { %v1115_v32 = vpop.f32.mrf.mxu0 }
 0x155   : > { %v3940_v33 = vpack.c.bf16 %v1217_v30, %v1215_v28  ;;  %v1116_v35 = vadd.f32 %v1115_v32, %v3854_v0  ;;  %3039 = vmatprep.mubr.bf16.mxu1 %v1254_v29  ;;  %v1218_v39 = vmax.f32 %v1114_v34, 0.0 }
 0x156   : > { %v1117_v36 = vpop.f32.mrf.mxu0 }
 0x157   : > { %v1118_v37 = vadd.f32 %v1117_v36, %v3850_v63  ;;  %v1219_v44 = vmax.f32 %v1116_v35, 0.0 }
 0x158   : > { %v1119_v38 = vpop.f32.mrf.mxu0 }
 0x159   : > { %v1220_v40 = vmax.f32 %v1118_v37, 0.0  ;;  %v1120_v42 = vadd.f32 %v1119_v38, %v3854_v0 }
 0x15a   : > { %v1123_v43 = vpop.f32.mrf.mxu0 }
 0x15b   : > { %v1255_v46 = vpack.c.bf16 %v1220_v40, %v1218_v39  ;;  %v1221_v48 = vmax.f32 %v1120_v42, 0.0  ;;  %v1124_v51 = vadd.f32 %v1123_v43, %v3850_v63 }
 0x15c   : > { %v1125_v49 = vpop.f32.mrf.mxu0 }
 0x15d   : > { %v3946_v50 = vpack.c.bf16 %v1221_v48, %v1219_v44  ;;  %v1126_v52 = vadd.f32 %v1125_v49, %v3854_v0  ;;  %3040 = vmatmul.mubr.bf16.gmra.mxu1 %v1255_v46  ;;  %v1222_v45 = vmax.f32 %v1124_v51, 0.0 }
 0x15e   : > { %v1127_v53 = vpop.f32.mrf.mxu0 }
 0x15f   : > { %v1128_v54 = vadd.f32 %v1127_v53, %v3850_v63  ;;  %v1223_v1 = vmax.f32 %v1126_v52, 0.0 }
 0x160   : > { %v1129_v56 = vpop.f32.mrf.mxu0 }
 0x161   : > { %v1224_v57 = vmax.f32 %v1128_v54, 0.0  ;;  %v1130_v61 = vadd.f32 %v1129_v56, %v3854_v0 }
 0x162   : > { %v1133_v62 = vpop.f32.mrf.mxu0 }
 0x163   : > { %v1256_v3 = vpack.c.bf16 %v1224_v57, %v1222_v45  ;;  %v1225_v4 = vmax.f32 %v1130_v61, 0.0  ;;  %v1134_v7 = vadd.f32 %v1133_v62, %v3850_v63 }
 0x164   : > { %v1135_v5 = vpop.f32.mrf.mxu0 }
 0x165   : > { %v3952_v6 = vpack.c.bf16 %v1225_v4, %v1223_v1  ;;  %v1136_v8 = vadd.f32 %v1135_v5, %v3854_v0  ;;  %3043 = vmatprep.mubr.bf16.mxu1 %v1256_v3  ;;  %v1226_v12 = vmax.f32 %v1134_v7, 0.0 }
 0x166   : > { %v1137_v9 = vpop.f32.mrf.mxu0 }
 0x167   : > { %v1138_v10 = vadd.f32 %v1137_v9, %v3850_v63  ;;  %v1227_v18 = vmax.f32 %v1136_v8, 0.0 }
 0x168   : > { %v1139_v11 = vpop.f32.mrf.mxu0 }
 0x169   : > { %v1228_v13 = vmax.f32 %v1138_v10, 0.0  ;;  %v1140_v15 = vadd.f32 %v1139_v11, %v3854_v0 }
 0x16a   : > { %v1143_v16 = vpop.f32.mrf.mxu0 }
 0x16b   : > { %v1257_v19 = vpack.c.bf16 %v1228_v13, %v1226_v12  ;;  %v1229_v20 = vmax.f32 %v1140_v15, 0.0  ;;  %v1144_v24 = vadd.f32 %v1143_v16, %v3850_v63 }
 0x16c   : > { %v1145_v21 = vpop.f32.mrf.mxu0 }
 0x16d   : > { %v3958_v23 = vpack.c.bf16 %v1229_v20, %v1227_v18  ;;  %v1146_v25 = vadd.f32 %v1145_v21, %v3854_v0  ;;  %3044 = vmatmul.mubr.bf16.gmra.mxu1 %v1257_v19  ;;  %v1230_v29 = vmax.f32 %v1144_v24, 0.0 }
 0x16e   : > { %v1147_v26 = vpop.f32.mrf.mxu0 }
 0x16f   : > { %v1148_v27 = vadd.f32 %v1147_v26, %v3850_v63  ;;  %v1231_v35 = vmax.f32 %v1146_v25, 0.0 }
 0x170   : > { %v1149_v28 = vpop.f32.mrf.mxu0 }
 0x171   : > { %v1232_v30 = vmax.f32 %v1148_v27, 0.0  ;;  %v1150_v32 = vadd.f32 %v1149_v28, %v3854_v0 }
 0x172   : > { %v1153_v34 = vpop.f32.mrf.mxu0 }
 0x173   : > { %v1258_v36 = vpack.c.bf16 %v1232_v30, %v1230_v29  ;;  %v1233_v37 = vmax.f32 %v1150_v32, 0.0  ;;  %v1154_v40 = vadd.f32 %v1153_v34, %v3850_v63 }
 0x174   : > { %v1155_v38 = vpop.f32.mrf.mxu0 }
 0x175   : > { %v1274_v39 = vpack.c.bf16 %v1233_v37, %v1231_v35  ;;  %v1156_v42 = vadd.f32 %v1155_v38, %v3854_v0  ;;  %3047 = vmatprep.mubr.bf16.mxu1 %v1258_v36  ;;  %v1234_v48 = vmax.f32 %v1154_v40, 0.0 }
 0x176   : > { %v1157_v43 = vpop.f32.mrf.mxu0 }
 0x177   : > { %v1158_v44 = vadd.f32 %v1157_v43, %v3850_v63  ;;  %v1235_v53 = vmax.f32 %v1156_v42, 0.0 }
 0x178   : > { %v1159_v46 = vpop.f32.mrf.mxu0 }
 0x179   : > { %v1236_v49 = vmax.f32 %v1158_v44, 0.0  ;;  %v1160_v51 = vadd.f32 %v1159_v46, %v3854_v0 }
 0x17a   : > { %v1163_v52 = vpop.f32.mrf.mxu0 }
 0x17b   : > { %v1259_v54 = vpack.c.bf16 %v1236_v49, %v1234_v48  ;;  %v1237_v56 = vmax.f32 %v1160_v51, 0.0  ;;  %v1164_v61 = vadd.f32 %v1163_v52, %v3850_v63 }
 0x17c   : > { %v1165_v45 = vpop.f32.mrf.mxu0 }
 0x17d   : > { %v1275_v57 = vpack.c.bf16 %v1237_v56, %v1235_v53  ;;  %v1166_v62 = vadd.f32 %v1165_v45, %v3854_v0  ;;  %3048 = vmatmul.mubr.bf16.gmra.mxu1 %v1259_v54  ;;  %v1238_v5 = vmax.f32 %v1164_v61, 0.0  ;;  %v2053_v54 = vld [vmem:[%s4999_s11 + $0x8] sm:$0xff]  ;;  %v2052_v56 = vld [vmem:[%s4999_s11] sm:$0xff] }
 0x17e   : > { %v1167_v1 = vpop.f32.mrf.mxu0 }
 0x17f   : > { %v1168_v3 = vadd.f32 %v1167_v1, %v3850_v63  ;;  %v1239_v10 = vmax.f32 %v1166_v62, 0.0 }
 0x180   : > { %v1169_v4 = vpop.f32.mrf.mxu0 }
 0x181   : > { %v1240_v7 = vmax.f32 %v1168_v3, 0.0  ;;  %v1170_v8 = vadd.f32 %v1169_v4, %v3854_v0 }
 0x182   : > { %v1173_v9 = vpop.f32.mrf.mxu0 }
 0x183   : > { %v1260_v11 = vpack.c.bf16 %v1240_v7, %v1238_v5  ;;  %v1241_v12 = vmax.f32 %v1170_v8, 0.0  ;;  %v1174_v16 = vadd.f32 %v1173_v9, %v3850_v63 }
 0x184   : > { %v1175_v13 = vpop.f32.mrf.mxu0 }
 0x185   : > { %v1276_v15 = vpack.c.bf16 %v1241_v12, %v1239_v10  ;;  %v1176_v18 = vadd.f32 %v1175_v13, %v3854_v0  ;;  %3051 = vmatprep.mubr.bf16.mxu1 %v1260_v11  ;;  %v1242_v24 = vmax.f32 %v1174_v16, 0.0  ;;  %v4089_v16 = vld [vmem:[%s4997_s9] ss:$0 sm:$0xff] }
 0x186   : > { %v1177_v19 = vpop.f32.mrf.mxu0 }
 0x187   : > { %v1178_v20 = vadd.f32 %v1177_v19, %v3850_v63  ;;  %v1243_v27 = vmax.f32 %v1176_v18, 0.0  ;;  %v2055_v63 = vld [vmem:[%s4999_s11 + $0x18] sm:$0xff]  ;;  %v4096_v19 = vld [vmem:[%s4994_s6] ss:$0 sm:$0xff] }
 0x188   : > { %v1179_v21 = vpop.f32.mrf.mxu0  ;;  %3103 = vmatprep.subr.mxu0 %v2055_v63 }
 0x189   : > { %v1244_v25 = vmax.f32 %v1178_v20, 0.0  ;;  %v1180_v26 = vadd.f32 %v1179_v21, %v3854_v0  ;;  %3104 = vmatpush3.msra.mxu0 %v2055_v63  ;;  %v2054_v0 = vld [vmem:[%s4999_s11 + $0x10] sm:$0xff] }
 0x18a   : > { %3105 = vmatprep.subr.mxu0 %v2054_v0 }
 0x18b   : > { %v1261_v28 = vpack.c.bf16 %v1244_v25, %v1242_v24  ;;  %v1245_v29 = vmax.f32 %v1180_v26, 0.0  ;;  %3106 = vmatpush3.msra.mxu0 %v2054_v0 }
 0x18c   : > { %3107 = vmatprep.subr.mxu0 %v2053_v54 }
 0x18d   : > { %v1277_v30 = vpack.c.bf16 %v1245_v29, %v1243_v27  ;;  %3052 = vmatmul.mubr.bf16.gmra.mxu1 %v1261_v28  ;;  %3108 = vmatpush3.msra.mxu0 %v2053_v54 }
 0x18e   : > { %3071 = vmatprep.mubr.bf16.mxu1 %v3866_v22  ;;  %3109 = vmatprep.subr.mxu0 %v2052_v56 }
 0x18f   : > { %3110 = vmatpush3.msra.mxu0 %v2052_v56 }
 0x195   : > { %3072 = vmatmul.mubr.bf16.vlgmr.msra.gmra.mxu1 %v3879_v41  ;;  %v3996_v41 = vpop.permute.xlu0 %622 }
 0x196   : > { %3075 = vmatprep.mubr.bf16.mxu1 %v3892_v60  ;;  %5093 = vst [vmem:[#allocation21_spill] sm:$0xff] %v3996_v41  ;;  %vm721_vm3 = vcmp.eq.s32.totalorder %v3996_v41, %v4089_v16 }
 0x19d   : > { %3076 = vmatmul.mubr.bf16.gmra.mxu1 %v3904_v14  ;;  %v4000_v14 = vpop.permute.xlu1 %628 }
 0x19e   : > { %3079 = vmatprep.mubr.bf16.mxu1 %v3916_v31  ;;  %5094 = vst [vmem:[#allocation22_spill] sm:$0xff] %v4000_v14  ;;  %vm5047_vm2 = vcmp.eq.s32.totalorder %v4000_v14, %v4089_v16 }
 0x1a5   : > { %3080 = vmatmul.mubr.bf16.gmra.mxu1 %v3922_v47  ;;  %v4004_v47 = vpop.permute.xlu0 %625 }
 0x1a6   : > { %3083 = vmatprep.mubr.bf16.mxu1 %v3928_v2  ;;  %5095 = vst [vmem:[#allocation23_spill] sm:$0xff] %v4004_v47  ;;  %v4006_v2 = vpop.permute.xlu1 %631  ;;  %vm722_vm6 = vcmp.eq.s32.totalorder %v4004_v47, %v4089_v16 }
 0x1a7   : > { %5096 = vst [vmem:[#allocation24_spill] sm:$0xff] %v4006_v2  ;;  %vm5045_vm5 = vcmp.eq.s32.totalorder %v4006_v2, %v4089_v16 }
 0x1ad   : > { %3084 = vmatmul.mubr.bf16.gmra.mxu1 %v3934_v17 }
 0x1ae   : > { %3087 = vmatprep.mubr.bf16.mxu1 %v3940_v33 }
 0x1b5   : > { %3088 = vmatmul.mubr.bf16.gmra.mxu1 %v3946_v50  ;;  %v4010_v50 = vpop.permute.xlu0 %634 }
 0x1b6   : > { %3091 = vmatprep.mubr.bf16.mxu1 %v3952_v6  ;;  %5097 = vst [vmem:[#allocation25_spill] sm:$0xff] %v4010_v50  ;;  %v4012_v6 = vpop.permute.xlu1 %637  ;;  %vm5029_vm8 = vcmp.eq.s32.totalorder %v4010_v50, %v4089_v16 }
 0x1b7   : > { %5098 = vst [vmem:[#allocation26_spill] sm:$0xff] %v4012_v6  ;;  %vm5032_vm7 = vcmp.eq.s32.totalorder %v4012_v6, %v4089_v16 }
 0x1b9   : > { %v4014_v32 = vpop.permute.xlu0 %640 }
 0x1ba   : > { %5099 = vst [vmem:[#allocation27_spill] sm:$0xff] %v4014_v32  ;;  %v4018_v35 = vpop.permute.xlu1 %643  ;;  %vm5019_vm10 = vcmp.eq.s32.totalorder %v4014_v32, %v4089_v16 }
 0x1bb   : > { %5100 = vst [vmem:[#allocation28_spill] sm:$0xff] %v4018_v35  ;;  %vm5027_vm9 = vcmp.eq.s32.totalorder %v4018_v35, %v4089_v16 }
 0x1bd   : > { %3092 = vmatmul.mubr.bf16.gmra.mxu1 %v3958_v23  ;;  %v4022_v37 = vpop.permute.xlu0 %646 }
 0x1be   : > { %3095 = vmatprep.mubr.bf16.mxu1 %v1274_v39  ;;  %5101 = vst [vmem:[#allocation29_spill] sm:$0xff] %v4022_v37  ;;  %v4026_v39 = vpop.permute.xlu1 %649  ;;  %vm5035_vm12 = vcmp.eq.s32.totalorder %v4022_v37, %v4089_v16 }
 0x1bf   : > { %5102 = vst [vmem:[#allocation30_spill] sm:$0xff] %v4026_v39  ;;  %vm5044_vm11 = vcmp.eq.s32.totalorder %v4026_v39, %v4089_v16 }
 0x1c1   : > { %v4030_v42 = vpop.permute.xlu0 %652 }
 0x1c2   : > { %5103 = vst [vmem:[#allocation31_spill] sm:$0xff] %v4030_v42  ;;  %v4032_v43 = vpop.permute.xlu1 %655  ;;  %vm5034_vm14 = vcmp.eq.s32.totalorder %v4030_v42, %v4089_v16 }
 0x1c3   : > { %5104 = vst [vmem:[#allocation32_spill] sm:$0xff] %v4032_v43  ;;  %vm5040_vm13 = vcmp.eq.s32.totalorder %v4032_v43, %v4089_v16 }
 0x1c5   : > { %3096 = vmatmul.mubr.bf16.gmra.mxu1 %v1275_v57  ;;  %v4036_v46 = vpop.permute.xlu0 %658 }
 0x1c6   : > { %3099 = vmatprep.mubr.bf16.mxu1 %v1276_v15  ;;  %v4040_v49 = vpop.permute.xlu1 %661  ;;  %vm5043_vm15 = vcmp.eq.s32.totalorder %v4036_v46, %v4089_v16 }
 0x1c7   : > { %vm5050_vm1 = vcmp.eq.s32.totalorder %v4040_v49, %v4089_v16 }
 0x1c9   : > { %v4044_v52 = vpop.permute.xlu0 %664 }
 0x1ca   : > { %5105 = vst [vmem:[#allocation33_spill] sm:$0xff] %v4044_v52  ;;  %v4054_v45 = vpop.permute.xlu1 %667 }
 0x1cb   : > { %vm5046_vm0 = vcmp.eq.s32.totalorder %v4054_v45, %v4089_v16 }
 0x1cd   : > { %3100 = vmatmul.mubr.bf16.gmra.mxu1 %v1277_v30  ;;  %v4058_v61 = vpop.permute.xlu0 %670 }
 0x1ce   : > { %v4060_v62 = vpop.permute.xlu1 %673 }
 0x1cf   : > { %5106 = vst [vmem:[#allocation34_spill] sm:$0xff] %v4060_v62 }
 0x1d1   : > { %v4066_v4 = vpop.permute.xlu0 %676 }
 0x1d2   : > { %5107 = vst [vmem:[#allocation35_spill] sm:$0xff] %v4066_v4  ;;  %v4068_v5 = vpop.permute.xlu1 %679 }
 0x1d3   : > { %5108 = vst [vmem:[#allocation36_spill] sm:$0xff] %v4068_v5 }
 0x1d5   : > { %v4072_v8 = vpop.permute.xlu0 %682 }
 0x1d6   : > { %5109 = vst [vmem:[#allocation37_spill] sm:$0xff] %v4072_v8  ;;  %v4076_v10 = vpop.permute.xlu1 %685 }
 0x1d7   : > { %5110 = vst [vmem:[#allocation38_spill] sm:$0xff] %v4076_v10 }
 0x1d9   : > { %v4080_v12 = vpop.permute.xlu0 %688 }
 0x1da   : > { %5111 = vst [vmem:[#allocation39_spill] sm:$0xff] %v4080_v12  ;;  %v4084_v15 = vpop.permute.xlu1 %691 }
 0x1db   : > { %5112 = vst [vmem:[#allocation40_spill] sm:$0xff] %v4084_v15 }
 0x1dd   : > { %v3994_v22 = vpop.f32.mrf.mxu1  ;;  %v4098_v20 = vpop.permute.xlu0 %694 }
 0x1de   : > { %5113 = vst [vmem:[#allocation41_spill] sm:$0xff] %v4098_v20  ;;  %v4115_v24 = vpop.permute.xlu1 %697  ;;  %v4119_v25 = vadd.f32 %v3994_v22, %v4096_v19 }
 0x1df   : > { %v3998_v60 = vpop.f32.mrf.mxu1  ;;  %5114 = vst [vmem:[#allocation42_spill] sm:$0xff] %v4115_v24 }
 0x1e0   : > { %v4123_v26 = vadd.f32 %v4096_v19, %v3998_v60 }
 0x1e1   : > { %v4002_v31 = vpop.f32.mrf.mxu1  ;;  %v4166_v60 = vpop.permute.xlu0 %700 }
 0x1e2   : > { %v4133_v28 = vadd.f32 %v4002_v31, %v4096_v19  ;;  %5115 = vst [vmem:[#allocation43_spill] sm:$0xff] %v4166_v60  ;;  %v1744_v31 = vsel %vm5047_vm2, %v4119_v25, -1e+30  ;;  %v4202_v56 = vpop.permute.xlu1 %703  ;;  %vm745_vm2 = vcmp.eq.s32.totalorder %v4098_v20, %v4089_v16 }
 0x1e3   : > { %v4008_v17 = vpop.f32.mrf.mxu1  ;;  %5116 = vst [vmem:[#allocation44_spill] sm:$0xff] %v4202_v56 }
 0x1e4   : > { %v4137_v29 = vadd.f32 %v4096_v19, %v4008_v17  ;;  %v1742_v17 = vsel %vm721_vm3, %v4123_v26, -1e+30 }
 0x1e5   : > { %v1775_v14 = vsel %vm1774_vm4, %v1742_v17, -inf }
 0x1e6   : > { %v4279_v37 = vpop.permute.xlu1 %709 }
 0x1ed   : > { %v3029_v33 = vpop.f32.mrf.mxu1 }
 0x1ee   : > { %v4113_v21 = vadd.f32 %v3029_v33, %v4096_v19 }
 0x1ef   : > { %v1399_v23 = vpop.f32.mrf.mxu1 }
 0x1f0   : > { %v4142_v30 = vadd.f32 %v4096_v19, %v1399_v23  ;;  %v1748_v0 = vsel %vm5019_vm10, %v4113_v21, -1e+30  ;;  %vm5042_vm10 = vcmp.eq.s32.totalorder %v4044_v52, %v4089_v16 }
 0x1f1   : > { %v4016_v34 = vpop.f32.mrf.mxu1  ;;  %v1783_v59 = vsel %vm1774_vm4, %v1748_v0, -inf }
 0x1f2   : > { %v4152_v63 = vadd.f32 %v4016_v34, %v4096_v19  ;;  %v1745_v34 = vsel %vm5045_vm5, %v4133_v28, -1e+30  ;;  %v1746_v54 = vsel %vm5029_vm8, %v4142_v30, -1e+30  ;;  %vm737_vm8 = vcmp.eq.s32.totalorder %v4058_v61, %v4089_v16 }
 0x1f3   : > { %v4020_v36 = vpop.f32.mrf.mxu1  ;;  %v1779_v35 = vsel %vm1774_vm4, %v1746_v54, -inf  ;;  %v4251_v54 = vpop.permute.xlu0 %706  ;;  %vm747_vm5 = vcmp.eq.s32.totalorder %v4166_v60, %v4089_v16 }
 0x1f4   : > { %v4160_v22 = vadd.f32 %v4096_v19, %v4020_v36  ;;  %v1743_v36 = vsel %vm722_vm6, %v4137_v29, -1e+30  ;;  %v1749_v55 = vsel %vm5027_vm9, %v4152_v63, -1e+30  ;;  %vm5049_vm9 = vcmp.eq.s32.totalorder %v4066_v4, %v4089_v16  ;;  %5117 = vst [vmem:[#allocation45_spill] sm:$0xff] %v4251_v54 }
 0x1f5   : > { %v1776_v6 = vsel %vm1774_vm4, %v1743_v36, -inf  ;;  %v1785_v47 = vsel %vm1774_vm4, %v1749_v55, -inf }
 0x1f6   : > { %v1747_v0 = vsel %vm5032_vm7, %v4160_v22, -1e+30  ;;  %vm5051_vm7 = vcmp.eq.s32.totalorder %v4068_v5, %v4089_v16 }
 0x1f7   : > { %v1781_v42 = vsel %vm1774_vm4, %v1747_v0, -inf }
 0x1fd   : > { %v4024_v38 = vpop.f32.mrf.mxu1 }
 0x1fe   : > { %v4182_v33 = vadd.f32 %v4024_v38, %v4096_v19 }
 0x1ff   : > { %v4028_v40 = vpop.f32.mrf.mxu1 }
 0x200   : > { %v4200_v38 = vadd.f32 %v4096_v19, %v4028_v40  ;;  %v1777_v40 = vsel %vm1774_vm4, %v1744_v31, -inf  ;;  %v1752_v31 = vsel %vm5034_vm14, %v4182_v33, -1e+30  ;;  %vm738_vm14 = vcmp.eq.s32.totalorder %v4060_v62, %v4089_v16 }
 0x201   : > { %v4034_v44 = vpop.f32.mrf.mxu1  ;;  %v1791_v0 = vsel %vm1774_vm4, %v1752_v31, -inf  ;;  %v1782_v31 = vmax.f32 %v1776_v6, %v1781_v42 }
 0x202   : > { %v4211_v32 = vadd.f32 %v4034_v44, %v4096_v19 }
 0x203   : > { %v4038_v48 = vpop.f32.mrf.mxu1 }
 0x204   : > { %v4215_v50 = vadd.f32 %v4096_v19, %v4038_v48  ;;  %v1778_v48 = vsel %vm1774_vm4, %v1745_v34, -inf  ;;  %v1750_v34 = vsel %vm5035_vm12, %v4200_v38, -1e+30  ;;  %v1753_v55 = vsel %vm5040_vm13, %v4211_v32, -1e+30 }
 0x205   : > { %vm5053_vm12 = vcmp.eq.s32.totalorder %v4084_v15, %v4089_v16  ;;  %v1787_v41 = vsel %vm1774_vm4, %v1750_v34, -inf  ;;  %vm743_vm13 = vcmp.eq.s32.totalorder %v4080_v12, %v4089_v16 }
 0x20d   : > { %v4042_v51 = vpop.f32.mrf.mxu1 }
 0x20e   : > { %v4229_v44 = vadd.f32 %v4042_v51, %v4096_v19  ;;  %v1784_v51 = vmax.f32 %v1777_v40, %v1783_v59  ;;  %v1751_v59 = vsel %vm5044_vm11, %v4215_v50, -1e+30  ;;  %v1780_v40 = vmax.f32 %v1775_v14, %v1779_v35 }
 0x20f   : > { %v4046_v53 = vpop.f32.mrf.mxu1  ;;  %v1789_v52 = vsel %vm1774_vm4, %v1751_v59, -inf  ;;  %vm748_vm11 = vcmp.eq.s32.totalorder %v4202_v56, %v4089_v16 }
 0x210   : > { %v4241_v17 = vadd.f32 %v4096_v19, %v4046_v53  ;;  %v1756_v43 = vsel %vm5042_vm10, %v4229_v44, -1e+30  ;;  %vm741_vm10 = vcmp.eq.s32.totalorder %v4072_v8, %v4089_v16 }
 0x211   : > { %v4056_v57 = vpop.f32.mrf.mxu1  ;;  %v1799_v34 = vsel %vm1774_vm4, %v1756_v43, -inf }
 0x212   : > { %v4266_v53 = vadd.f32 %v4056_v57, %v4096_v19  ;;  %v1786_v57 = vmax.f32 %v1778_v48, %v1785_v47  ;;  %v1754_v14 = vsel %vm5043_vm15, %v4241_v17, -1e+30  ;;  %v1792_v48 = vmax.f32 %v1784_v51, %v1791_v0 }
 0x213   : > { %v4062_v1 = vpop.f32.mrf.mxu1  ;;  %vm742_vm15 = vcmp.eq.s32.totalorder %v4076_v10, %v4089_v16  ;;  %v1795_v51 = vsel %vm1774_vm4, %v1754_v14, -inf  ;;  %v1790_v0 = vmax.f32 %v1782_v31, %v1789_v52 }
 0x214   : > { %v4277_v39 = vadd.f32 %v4096_v19, %v4062_v1  ;;  %v1793_v1 = vsel %vm1774_vm4, %v1753_v55, -inf  ;;  %v1757_v6 = vsel %vm5046_vm0, %v4266_v53, -1e+30  ;;  %v4320_v55 = vpop.permute.xlu0 %712  ;;  %vm746_vm0 = vcmp.eq.s32.totalorder %v4115_v24, %v4089_v16 }
 0x215   : > { %5118 = vst [vmem:[#allocation46_spill] sm:$0xff] %v4320_v55  ;;  %v1800_v14 = vmax.f32 %v1792_v48, %v1799_v34 }
 0x216   : > { %v1755_v43 = vsel %vm5050_vm1, %v4277_v39, -1e+30  ;;  %vm751_vm1 = vcmp.eq.s32.totalorder %v4320_v55, %v4089_v16 }
 0x217   : > { %v1797_v4 = vsel %vm1774_vm4, %v1755_v43, -inf }
 0x21d   : > { %v4064_v3 = vpop.f32.mrf.mxu1 }
 0x21e   : > { %v4290_v35 = vadd.f32 %v4064_v3, %v4096_v19 }
 0x21f   : > { %v4070_v7 = vpop.f32.mrf.mxu1 }
 0x220   : > { %v4298_v47 = vadd.f32 %v4096_v19, %v4070_v7  ;;  %v1788_v7 = vmax.f32 %v1780_v40, %v1787_v41  ;;  %v1760_v41 = vsel %vm5049_vm9, %v4290_v35, -1e+30  ;;  %vm749_vm9 = vcmp.eq.s32.totalorder %v4251_v54, %v4089_v16 }
 0x221   : > { %v4074_v9 = vpop.f32.mrf.mxu1  ;;  %v1807_v34 = vsel %vm1774_vm4, %v1760_v41, -inf }
 0x222   : > { %v4311_v42 = vadd.f32 %v4074_v9, %v4096_v19  ;;  %v1794_v9 = vmax.f32 %v1786_v57, %v1793_v1  ;;  %v4339_v57 = vpop.permute.xlu1 %715  ;;  %v1758_v52 = vsel %vm737_vm8, %v4298_v47, -1e+30  ;;  %v1796_v1 = vmax.f32 %v1788_v7, %v1795_v51 }
 0x223   : > { %v4078_v11 = vpop.f32.mrf.mxu1  ;;  %v1808_v15 = vmax.f32 %v1800_v14, %v1807_v34 }
 0x224   : > { %v4324_v59 = vadd.f32 %v4096_v19, %v4078_v11  ;;  %v1801_v11 = vsel %vm1774_vm4, %v1757_v6, -inf }
 0x225   : > { %v1802_v43 = vmax.f32 %v1794_v9, %v1801_v11 }
 0x226   : > { %v1759_v6 = vsel %vm738_vm14, %v4324_v59, -1e+30 }
 0x22d   : > { %v4082_v13 = vpop.f32.mrf.mxu1 }
 0x22e   : > { %v4347_v31 = vadd.f32 %v4082_v13, %v4096_v19 }
 0x22f   : > { %v4091_v18 = vpop.f32.mrf.mxu1 }
 0x230   : > { %v4360_v48 = vadd.f32 %v4096_v19, %v4091_v18  ;;  %v1803_v18 = vsel %vm1774_vm4, %v1758_v52, -inf  ;;  %v1798_v52 = vmax.f32 %v1790_v0, %v1797_v4 }
 0x231   : > { %v4129_v27 = vpop.f32.mrf.mxu1  ;;  %v1804_v14 = vmax.f32 %v1796_v1, %v1803_v18 }
 0x232   : > { %v4336_v40 = vadd.f32 %v4129_v27, %v4096_v19  ;;  %v1761_v27 = vsel %vm5051_vm7, %v4311_v42, -1e+30  ;;  %vm5065_vm7 = vcmp.eq.s32.totalorder %v4339_v57, %v4089_v16 }
 0x233   : > { %v4184_v23 = vpop.f32.mrf.mxu1 }
 0x234   : > { %v4369_v7 = vadd.f32 %v4096_v19, %v4184_v23  ;;  %v1765_v41 = vsel %vm5053_vm12, %v4336_v40, -1e+30  ;;  %v1809_v23 = vsel %vm1774_vm4, %v1761_v27, -inf  ;;  %vm750_vm12 = vcmp.eq.s32.totalorder %v4279_v37, %v4089_v16 }
 0x235   : > { %v1762_v27 = vsel %vm741_vm10, %v4360_v48, -1e+30  ;;  %v1817_v62 = vsel %vm1774_vm4, %v1765_v41, -inf }
 0x236   : > { %v1811_v10 = vsel %vm1774_vm4, %v1762_v27, -inf }
 0x23d   : > { %v4217_v2 = vpop.f32.mrf.mxu1 }
 0x23e   : > { %v4383_v5 = vadd.f32 %v4217_v2, %v4096_v19  ;;  %v1805_v2 = vsel %vm1774_vm4, %v1759_v6, -inf }
 0x23f   : > { %v1479_v36 = vpop.f32.mrf.mxu1 }
 0x240   : > { %v4391_v9 = vadd.f32 %v4096_v19, %v1479_v36  ;;  %v1763_v36 = vsel %vm742_vm15, %v4369_v7, -1e+30  ;;  %v1768_v6 = vsel %vm747_vm5, %v4383_v5, -1e+30 }
 0x241   : > { %v3050_v3 = vpop.f32.mrf.mxu1  ;;  %v1823_v60 = vsel %vm1774_vm4, %v1768_v6, -inf }
 0x242   : > { %v4372_v51 = vadd.f32 %v3050_v3, %v4096_v19  ;;  %v1764_v3 = vsel %vm743_vm13, %v4347_v31, -1e+30  ;;  %v1766_v56 = vsel %vm745_vm2, %v4391_v9, -1e+30 }
 0x243   : > { %v1482_v13 = vpop.f32.mrf.mxu1  ;;  %v1815_v34 = vsel %vm1774_vm4, %v1764_v3, -inf }
 0x244   : > { %v4394_v11 = vadd.f32 %v4096_v19, %v1482_v13  ;;  %v1769_v4 = vsel %vm748_vm11, %v4372_v51, -1e+30  ;;  %v1810_v13 = vmax.f32 %v1802_v43, %v1809_v23  ;;  %v1806_v43 = vmax.f32 %v1798_v52, %v1805_v2 }
 0x245   : > { %v1813_v23 = vsel %vm1774_vm4, %v1763_v36, -inf  ;;  %v1825_v3 = vsel %vm1774_vm4, %v1769_v4, -inf  ;;  %v1812_v2 = vmax.f32 %v1804_v14, %v1811_v10  ;;  %v1819_v36 = vsel %vm1774_vm4, %v1766_v56, -inf }
 0x246   : > { %v1818_v18 = vmax.f32 %v1810_v13, %v1817_v62  ;;  %v1816_v62 = vmax.f32 %v1808_v15, %v1815_v34  ;;  %v1814_v6 = vmax.f32 %v1806_v43, %v1813_v23 }
 0x247   : > { %v1820_v56 = vmax.f32 %v1812_v2, %v1819_v36 }
 0x248   : > { %v1826_v24 = vmax.f32 %v1818_v18, %v1825_v3  ;;  %v1824_v8 = vmax.f32 %v1816_v62, %v1823_v60 }
 0x24d   : > { %v3053_v12 = vpop.f32.mrf.mxu1 }
 0x24e   : > { %v4413_v0 = vadd.f32 %v3053_v12, %v4096_v19  ;;  %v1767_v12 = vsel %vm746_vm0, %v4394_v11, -1e+30 }
 0x24f   : > { %v1495_v41 = vpop.f32.mrf.mxu1  ;;  %v1821_v4 = vsel %vm1774_vm4, %v1767_v12, -inf }
 0x250   : > { %v4430_v1 = vadd.f32 %v4096_v19, %v1495_v41  ;;  %v1772_v20 = vsel %vm751_vm1, %v4413_v0, -1e+30  ;;  %v1822_v14 = vmax.f32 %v1814_v6, %v1821_v4  ;;  %v4461_v4 = vld [vmem:[%s3703_s25] sm:$0x1] }
 0x251   : > { %v3054_v27 = vpop.f32.mrf.mxu1 }
 0x252   : > { %v1770_v41 = vsel %vm749_vm9, %v4430_v1, -1e+30  ;;  %v4444_v52 = vadd.f32 %v3054_v27, %v4096_v19  ;;  %v1831_v27 = vsel %vm1774_vm4, %v1772_v20, -inf }
 0x253   : > { %v1498_v13 = vpop.f32.mrf.mxu1  ;;  %v1827_v15 = vsel %vm1774_vm4, %v1770_v41, -inf  ;;  %v1832_v18 = vmax.f32 %v1824_v8, %v1831_v27 }
 0x254   : > { %v1773_v55 = vsel %vm5065_vm7, %v4444_v52, -1e+30  ;;  %v1499_v54 = vadd.f32 %v4096_v19, %v1498_v13  ;;  %v1828_v23 = vmax.f32 %v1820_v56, %v1827_v15  ;;  %vm2560_vm7 = vcmask 253952  }
 0x255   : > { %v1833_v10 = vsel %vm1774_vm4, %v1773_v55, -inf }
 0x256   : > { %v1834_v34 = vmax.f32 %v1826_v24, %v1833_v10  ;;  %v1771_v12 = vsel %vm750_vm12, %v1499_v54, -1e+30 }
 0x257   : > { %v1829_v43 = vsel %vm1774_vm4, %v1771_v12, -inf }
 0x258   : > { %v1830_v19 = vmax.f32 %v1822_v14, %v1829_v43  ;;  %v1836_v60 = vmax.f32 %v1832_v18, %v1834_v34 }
 0x25a   : > { %v1835_v20 = vmax.f32 %v1828_v23, %v1830_v19 }
 0x25c   : > { %v1837_v3 = vmax.f32 %v1835_v20, %v1836_v60 }
 0x25e   : > { %v1838_v41 = vrot.slane %v1837_v3, 4 }
 0x260   : > { %v1839_v62 = vmax.f32 %v1837_v3, %v1838_v41 }
 0x262   : > { %v1840_v55 = vrot.slane %v1839_v62, 2 }
 0x264   : > { %v1841_v2 = vmax.f32 %v1839_v62, %v1840_v55 }
 0x266   : > { %v1842_v36 = vrot.slane %v1841_v2, 1 }
 0x268   : > { %v1843_v24 = vmax.f32 %v1841_v2, %v1842_v36 }
 0x26a   : > { %v4464_v13 = vmax.f32 %v4461_v4, %v1843_v24 }
 0x26c   : > { %v1846_v8 = vsub.f32 %v4461_v4, %v4464_v13  ;;  %v4470_v6 = vrot.slane %v4464_v13, %v3841_v58  ;;  %2561 = vst.msk [vmem:[%s3703_s25] sm:$0x1] %vm2560_vm7, %v4464_v13 }
 0x26e   : > { %v1884_v27 = vsub.f32 %v1499_v54, %v4470_v6  ;;  %v1855_v10 = vsub.f32 %v4123_v26, %v4470_v6  ;;  %v1856_v56 = vsub.f32 %v4137_v29, %v4470_v6  ;;  %v1857_v14 = vsub.f32 %v4119_v25, %v4470_v6 }
 0x26f   : > { %v1858_v34 = vsub.f32 %v4133_v28, %v4470_v6  ;;  %v1859_v12 = vsub.f32 %v4142_v30, %v4470_v6  ;;  %v1860_v54 = vsub.f32 %v4160_v22, %v4470_v6  ;;  %v1861_v26 = vsub.f32 %v4113_v21, %v4470_v6 }
 0x270   : > { %v1945_v15 = vmul.f32 1.442695, %v1884_v27  ;;  %v1887_v43 = vmul.f32 1.442695, %v1855_v10  ;;  %v1889_v18 = vmul.f32 1.442695, %v1856_v56  ;;  %v1862_v25 = vsub.f32 %v4152_v63, %v4470_v6 }
 0x271   : > { %v1891_v23 = vmul.f32 1.442695, %v1857_v14  ;;  %v1893_v29 = vmul.f32 1.442695, %v1858_v34  ;;  %v1895_v19 = vmul.f32 1.442695, %v1859_v12  ;;  %v1863_v28 = vsub.f32 %v4200_v38, %v4470_v6 }
 0x272   : > { %3303 = vpow2.f32 %v1945_v15  ;;  %v1897_v60 = vmul.f32 1.442695, %v1860_v54  ;;  %v1899_v30 = vmul.f32 1.442695, %v1861_v26  ;;  %v1864_v22 = vsub.f32 %v4215_v50, %v4470_v6  ;;  %v5121_v12 = vld [vmem:[#allocation22_spill] sm:$0xff]  ;;  %v5123_v26 = vld [vmem:[#allocation24_spill] sm:$0xff] }
 0x273   : > { %3305 = vpow2.f32 %v1887_v43  ;;  %v1901_v20 = vmul.f32 1.442695, %v1862_v25  ;;  %v1865_v21 = vsub.f32 %v4182_v33, %v4470_v6  ;;  %v1903_v3 = vmul.f32 1.442695, %v1863_v28 }
 0x274   : > { %3307 = vpow2.f32 %v1889_v18  ;;  %v1866_v41 = vsub.f32 %v4211_v32, %v4470_v6  ;;  %v1905_v62 = vmul.f32 1.442695, %v1864_v22  ;;  %v1867_v38 = vsub.f32 %v4241_v17, %v4470_v6 }
 0x275   : > { %3309 = vpow2.f32 %v1891_v23  ;;  %v1907_v55 = vmul.f32 1.442695, %v1865_v21  ;;  %v1868_v33 = vsub.f32 %v4277_v39, %v4470_v6  ;;  %v1869_v32 = vsub.f32 %v4229_v44, %v4470_v6 }
 0x276   : > { %3311 = vpow2.f32 %v1893_v29  ;;  %v1909_v36 = vmul.f32 1.442695, %v1866_v41  ;;  %v1911_v10 = vmul.f32 1.442695, %v1867_v38  ;;  %v1870_v34 = vsub.f32 %v4266_v53, %v4470_v6  ;;  %v5127_v41 = vld [vmem:[#allocation26_spill] sm:$0xff] }
 0x277   : > { %3313 = vpow2.f32 %v1895_v19  ;;  %v1913_v18 = vmul.f32 1.442695, %v1868_v33  ;;  %v1871_v53 = vsub.f32 %v4298_v47, %v4470_v6  ;;  %v1872_v21 = vsub.f32 %v4324_v59, %v4470_v6 }
 0x278   : > { %3315 = vpow2.f32 %v1897_v60  ;;  %v1915_v60 = vmul.f32 1.442695, %v1869_v32  ;;  %v1874_v27 = vsub.f32 %v4311_v42, %v4470_v6 }
 0x279   : > { %3317 = vpow2.f32 %v1899_v30  ;;  %v5125_v30 = vld [vmem:[#allocation25_spill] sm:$0xff]  ;;  %v1919_v59 = vmul.f32 1.442695, %v1871_v53  ;;  %v1877_v53 = vsub.f32 %v4347_v31, %v4470_v6 }
 0x27a   : > { %3319 = vpow2.f32 %v1901_v20 }
 0x27b   : > { %3321 = vpow2.f32 %v1903_v3 }
 0x27c   : > { %3323 = vpow2.f32 %v1905_v62 }
 0x27d   : > { %3325 = vpow2.f32 %v1907_v55  ;;  %v1873_v55 = vsub.f32 %v4290_v35, %v4470_v6 }
 0x27e   : > { %3327 = vpow2.f32 %v1909_v36  ;;  %v5129_v36 = vld [vmem:[#allocation27_spill] sm:$0xff] }
 0x27f   : > { %v3304_v63 = vpop.eup %3303  ;;  %3329 = vpow2.f32 %v1911_v10  ;;  %v5131_v10 = vld [vmem:[#allocation28_spill] sm:$0xff]  ;;  %v1923_v42 = vmul.f32 1.442695, %v1873_v55 }
 0x280   : > { %v4505_v50 = vsel %vm750_vm12, %v3304_v63, 0.0  ;;  %v3306_v2 = vpop.eup %3305  ;;  %vm5126_vm12 = vcmp.eq.s32.totalorder %v5125_v30, %v4089_v16  ;;  %v1917_v63 = vmul.f32 1.442695, %v1870_v34  ;;  %3331 = vpow2.f32 %v1913_v18 }
 0x281   : > { %v3308_v24 = vpop.eup %3307  ;;  %v1951_v17 = vsel %vm721_vm3, %v3306_v2, 0.0  ;;  %vm5122_vm3 = vcmp.eq.s32.totalorder %v5121_v12, %v4089_v16  ;;  %3333 = vpow2.f32 %v1915_v60 }
 0x282   : > { %v3310_v15 = vpop.eup %3309  ;;  %v1952_v56 = vsel %vm722_vm6, %v3308_v24, 0.0  ;;  %v1983_v14 = vsel %vm1774_vm4, %v1951_v17, 0.0  ;;  %3111 = vmatprep.mubr.msk.f32.mxu0 %vm1774_vm4, %v1951_v17  ;;  %vm5124_vm6 = vcmp.eq.s32.totalorder %v5123_v26, %v4089_v16  ;;  %3335 = vpow2.f32 %v1917_v63  ;;  %v5135_v26 = vld [vmem:[#allocation30_spill] sm:$0xff]  ;;  %v5139_v63 = vld [vmem:[#allocation32_spill] sm:$0xff] }
 0x283   : > { %v3312_v39 = vpop.eup %3311  ;;  %v1984_v44 = vsel %vm1774_vm4, %v1952_v56, 0.0  ;;  %3112 = vmatmul.mubr.msk.f32.vlgmr.msra.gmra.mxu0 %vm1774_vm4, %v1952_v56  ;;  %v1953_v54 = vsel %vm5122_vm3, %v3310_v15, 0.0  ;;  %vm5128_vm3 = vcmp.eq.s32.totalorder %v5127_v41, %v4089_v16  ;;  %v1921_v15 = vmul.f32 1.442695, %v1872_v21 }
 0x284   : > { %v3314_v43 = vpop.eup %3313  ;;  %v1985_v23 = vadd.f32 %v1984_v44, %v1983_v14  ;;  %3114 = vmatprep.mubr.msk.f32.mxu0 %vm1774_vm4, %v1953_v54  ;;  %v1954_v29 = vsel %vm5124_vm6, %v3312_v39, 0.0  ;;  %v1986_v25 = vsel %vm1774_vm4, %v1953_v54, 0.0  ;;  %vm5130_vm6 = vcmp.eq.s32.totalorder %v5129_v36, %v4089_v16  ;;  %v5133_v44 = vld [vmem:[#allocation29_spill] sm:$0xff] }
 0x285   : > { %v3316_v19 = vpop.eup %3315  ;;  %v1955_v22 = vsel %vm5126_vm12, %v3314_v43, 0.0  ;;  %v1988_v3 = vsel %vm1774_vm4, %v1954_v29, 0.0  ;;  %vm5132_vm12 = vcmp.eq.s32.totalorder %v5131_v10, %v4089_v16  ;;  %v1875_v14 = vsub.f32 %v4360_v48, %v4470_v6 }
 0x286   : > { %v1987_v28 = vadd.f32 %v1986_v25, %v1985_v23  ;;  %v3318_v20 = vpop.eup %3317  ;;  %v1956_v62 = vsel %vm5128_vm3, %v3316_v19, 0.0  ;;  %v1990_v2 = vsel %vm1774_vm4, %v1955_v22, 0.0  ;;  %3337 = vpow2.f32 %v1919_v59 }
 0x287   : > { %3115 = vmatmul.mubr.msk.f32.gmra.mxu0 %vm1774_vm4, %v1954_v29  ;;  %v3320_v38 = vpop.eup %3319  ;;  %v1957_v24 = vsel %vm5130_vm6, %v3318_v20, 0.0  ;;  %v1992_v17 = vsel %vm1774_vm4, %v1956_v62, 0.0  ;;  %vm5134_vm3 = vcmp.eq.s32.totalorder %v5133_v44, %v4089_v16  ;;  %v1876_v43 = vsub.f32 %v4369_v7, %v4470_v6 }
 0x288   : > { %v1989_v47 = vadd.f32 %v1988_v3, %v1987_v28  ;;  %3117 = vmatprep.mubr.msk.f32.mxu0 %vm1774_vm4, %v1955_v22  ;;  %v3322_v32 = vpop.eup %3321  ;;  %v1958_v37 = vsel %vm5132_vm12, %v3320_v38, 0.0  ;;  %v1994_v39 = vsel %vm1774_vm4, %v1957_v24, 0.0  ;;  %v1925_v23 = vmul.f32 1.442695, %v1874_v27  ;;  %v5137_v28 = vld [vmem:[#allocation31_spill] sm:$0xff] }
 0x289   : > { %v3324_v56 = vpop.eup %3323  ;;  %v1959_v12 = vsel %vm5134_vm3, %v3322_v32, 0.0  ;;  %v1996_v18 = vsel %vm1774_vm4, %v1958_v37, 0.0  ;;  %3339 = vpow2.f32 %v1921_v15  ;;  %vm5136_vm6 = vcmp.eq.s32.totalorder %v5135_v26, %v4089_v16 }
 0x28a   : > { %v1991_v33 = vadd.f32 %v1990_v2, %v1989_v47  ;;  %v3326_v54 = vpop.eup %3325  ;;  %v1960_v29 = vsel %vm5136_vm6, %v3324_v56, 0.0  ;;  %v1998_v25 = vsel %vm1774_vm4, %v1959_v12, 0.0  ;;  %v1927_v7 = vmul.f32 1.442695, %v1875_v14 }
 0x28b   : > { %3118 = vmatmul.mubr.msk.f32.gmra.mxu0 %vm1774_vm4, %v1956_v62  ;;  %v3328_v19 = vpop.eup %3327  ;;  %3341 = vpow2.f32 %v1923_v42  ;;  %vm5138_vm12 = vcmp.eq.s32.totalorder %v5137_v28, %v4089_v16  ;;  %v1878_v20 = vsub.f32 %v4336_v40, %v4470_v6  ;;  %v2000_v21 = vsel %vm1774_vm4, %v1960_v29, 0.0 }
 0x28c   : > { %v1993_v35 = vadd.f32 %v1992_v17, %v1991_v33  ;;  %3120 = vmatprep.mubr.msk.f32.mxu0 %vm1774_vm4, %v1957_v24  ;;  %v1961_v30 = vsel %vm5138_vm12, %v3326_v54, 0.0  ;;  %v3330_v22 = vpop.eup %3329  ;;  %v1929_v3 = vmul.f32 1.442695, %v1876_v43  ;;  %3343 = vpow2.f32 %v1925_v23 }
 0x28d   : > { %vm5140_vm3 = vcmp.eq.s32.totalorder %v5139_v63, %v4089_v16  ;;  %v3332_v41 = vpop.eup %3331  ;;  %v1879_v62 = vsub.f32 %v4391_v9, %v4470_v6  ;;  %v2002_v38 = vsel %vm1774_vm4, %v1961_v30, 0.0  ;;  %v1931_v40 = vmul.f32 1.442695, %v1877_v53 }
 0x28e   : > { %v1995_v34 = vadd.f32 %v1994_v39, %v1993_v35  ;;  %v1962_v47 = vsel %vm5140_vm3, %v3328_v19, 0.0  ;;  %3345 = vpow2.f32 %v1927_v7  ;;  %vm5141_vm6 = vcmp.eq.s32.totalorder %v4036_v46, %v4089_v16  ;;  %v3334_v59 = vpop.eup %3333  ;;  %v5143_v35 = vld [vmem:[#allocation33_spill] sm:$0xff] }
 0x28f   : > { %3121 = vmatmul.mubr.msk.f32.gmra.mxu0 %vm1774_vm4, %v1958_v37  ;;  %v1963_v2 = vsel %vm5141_vm6, %v3330_v22, 0.0  ;;  %v1880_v33 = vsub.f32 %v4394_v11, %v4470_v6  ;;  %v2004_v36 = vsel %vm1774_vm4, %v1962_v47, 0.0  ;;  %v1933_v24 = vmul.f32 1.442695, %v1878_v20  ;;  %v3336_v27 = vpop.eup %3335 }
 0x290   : > { %v1997_v48 = vadd.f32 %v1996_v18, %v1995_v34  ;;  %3123 = vmatprep.mubr.msk.f32.mxu0 %vm1774_vm4, %v1959_v12  ;;  %3347 = vpow2.f32 %v1929_v3  ;;  %vm5142_vm12 = vcmp.eq.s32.totalorder %v4040_v49, %v4089_v16  ;;  %v1881_v46 = vsub.f32 %v4383_v5, %v4470_v6 }
 0x291   : > { %v1964_v32 = vsel %vm5142_vm12, %v3332_v41, 0.0  ;;  %v2006_v17 = vsel %vm1774_vm4, %v1963_v2, 0.0  ;;  %v1935_v11 = vmul.f32 1.442695, %v1879_v62  ;;  %3349 = vpow2.f32 %v1931_v40 }
 0x292   : > { %v1999_v60 = vadd.f32 %v1998_v25, %v1997_v48  ;;  %vm5144_vm3 = vcmp.eq.s32.totalorder %v5143_v35, %v4089_v16  ;;  %v1882_v56 = vsub.f32 %v4372_v51, %v4470_v6  ;;  %v2008_v49 = vsel %vm1774_vm4, %v1964_v32, 0.0  ;;  %v5147_v25 = vld [vmem:[#allocation35_spill] sm:$0xff] }
 0x293   : > { %3124 = vmatmul.mubr.msk.f32.gmra.mxu0 %vm1774_vm4, %v1960_v29  ;;  %v1965_v10 = vsel %vm5144_vm3, %v3334_v59, 0.0  ;;  %v3338_v37 = vpop.eup %3337  ;;  %v1937_v14 = vmul.f32 1.442695, %v1880_v33  ;;  %3351 = vpow2.f32 %v1933_v24  ;;  %vm5145_vm6 = vcmp.eq.s32.totalorder %v4054_v45, %v4089_v16 }
 0x294   : > { %v2001_v31 = vadd.f32 %v2000_v21, %v1999_v60  ;;  %3126 = vmatprep.mubr.msk.f32.mxu0 %vm1774_vm4, %v1961_v30  ;;  %v1966_v39 = vsel %vm5145_vm6, %v3336_v27, 0.0  ;;  %v1883_v34 = vsub.f32 %v4430_v1, %v4470_v6  ;;  %v2010_v44 = vsel %vm1774_vm4, %v1965_v10, 0.0 }
 0x295   : > { %v1939_v51 = vmul.f32 1.442695, %v1881_v46  ;;  %3353 = vpow2.f32 %v1935_v11  ;;  %v1967_v54 = vsel %vm737_vm8, %v3338_v37, 0.0  ;;  %v2012_v18 = vsel %vm1774_vm4, %v1966_v39, 0.0  ;;  %v5154_v46 = vld [vmem:[#allocation40_spill] sm:$0xff] }
 0x296   : > { %v2003_v55 = vadd.f32 %v2002_v38, %v2001_v31  ;;  %v3340_v42 = vpop.eup %3339  ;;  %v1941_v45 = vmul.f32 1.442695, %v1882_v56  ;;  %3355 = vpow2.f32 %v1937_v14  ;;  %v1885_v29 = vsub.f32 %v4413_v0, %v4470_v6  ;;  %v5149_v0 = vld [vmem:[#allocation36_spill] sm:$0xff] }
 0x297   : > { %3127 = vmatmul.mubr.msk.f32.gmra.mxu0 %vm1774_vm4, %v1962_v47  ;;  %v1968_v48 = vsel %vm738_vm14, %v3340_v42, 0.0  ;;  %v2014_v61 = vsel %vm1774_vm4, %v1967_v54, 0.0  ;;  %v1943_v19 = vmul.f32 1.442695, %v1883_v34  ;;  %3357 = vpow2.f32 %v1939_v51 }
 0x298   : > { %v2005_v9 = vadd.f32 %v2004_v36, %v2003_v55  ;;  %3129 = vmatprep.mubr.msk.f32.mxu0 %vm1774_vm4, %v1963_v2  ;;  %v3342_v43 = vpop.eup %3341  ;;  %vm5148_vm8 = vcmp.eq.s32.totalorder %v5147_v25, %v4089_v16  ;;  %v2016_v28 = vsel %vm1774_vm4, %v1968_v48, 0.0  ;;  %v1886_v30 = vsub.f32 %v4444_v52, %v4470_v6 }
 0x299   : > { %v3344_v26 = vpop.eup %3343  ;;  %v1969_v7 = vsel %vm5148_vm8, %v3342_v43, 0.0  ;;  %3359 = vpow2.f32 %v1941_v45  ;;  %vm5150_vm14 = vcmp.eq.s32.totalorder %v5149_v0, %v4089_v16  ;;  %v1947_v31 = vmul.f32 1.442695, %v1885_v29 }
 0x29a   : > { %v2007_v15 = vadd.f32 %v2006_v17, %v2005_v9  ;;  %v1970_v20 = vsel %vm5150_vm14, %v3344_v26, 0.0  ;;  %v2018_v3 = vsel %vm1774_vm4, %v1969_v7, 0.0  ;;  %3361 = vpow2.f32 %v1943_v19 }
 0x29b   : > { %3130 = vmatmul.mubr.msk.f32.gmra.mxu0 %vm1774_vm4, %v1964_v32  ;;  %v3346_v60 = vpop.eup %3345  ;;  %v2020_v52 = vsel %vm1774_vm4, %v1970_v20, 0.0  ;;  %v1949_v6 = vmul.f32 1.442695, %v1886_v30  ;;  %3363 = vpow2.f32 %v1947_v31  ;;  %v2040_v0 = vsel %vm1774_vm4, %v4505_v50, 0.0 }
 0x29c   : > { %v2009_v5 = vadd.f32 %v2008_v49, %v2007_v15  ;;  %3132 = vmatprep.mubr.msk.f32.mxu0 %vm1774_vm4, %v1965_v10  ;;  %v1971_v41 = vsel %vm741_vm10, %v3346_v60, 0.0  ;;  %vm5155_vm10 = vcmp.eq.s32.totalorder %v5154_v46, %v4089_v16 }
 0x29d   : > { %v3348_v21 = vpop.eup %3347  ;;  %v2022_v59 = vsel %vm1774_vm4, %v1971_v41, 0.0  ;;  %3365 = vpow2.f32 %v1949_v6 }
 0x29e   : > { %v2011_v12 = vadd.f32 %v2010_v44, %v2009_v5  ;;  %v3350_v62 = vpop.eup %3349  ;;  %v1972_v55 = vsel %vm742_vm15, %v3348_v21, 0.0  ;;  %v4742_v5 = vld [vmem:[%s4996_s8] ss:$0 sm:$0xff] }
 0x29f   : > { %3133 = vmatmul.mubr.msk.f32.gmra.mxu0 %vm1774_vm4, %v1966_v39  ;;  %v1973_v24 = vsel %vm743_vm13, %v3350_v62, 0.0  ;;  %v2024_v32 = vsel %vm1774_vm4, %v1972_v55, 0.0  ;;  %v2562_v62 = vld [vmem:[%s3706_s10] sm:$0x1] }
 0x2a0   : > { %v2013_v23 = vadd.f32 %v2012_v18, %v2011_v12  ;;  %3135 = vmatprep.mubr.msk.f32.mxu0 %vm1774_vm4, %v1967_v54  ;;  %v3352_v2 = vpop.eup %3351  ;;  %v2026_v15 = vsel %vm1774_vm4, %v1973_v24, 0.0 }
 0x2a1   : > { %v1974_v17 = vsel %vm5155_vm10, %v3352_v2, 0.0 }
 0x2a2   : > { %v2015_v53 = vadd.f32 %v2014_v61, %v2013_v23  ;;  %v3354_v9 = vpop.eup %3353  ;;  %v2028_v49 = vsel %vm1774_vm4, %v1974_v17, 0.0 }
 0x2a3   : > { %3136 = vmatmul.mubr.msk.f32.gmra.mxu0 %vm1774_vm4, %v1968_v48  ;;  %v3356_v11 = vpop.eup %3355  ;;  %v1975_v37 = vsel %vm745_vm2, %v3354_v9, 0.0  ;;  %vm5162_vm2 = vcmp.eq.s32.totalorder %v4339_v57, %v4089_v16  ;;  %v4716_v9 = vld [vmem:[%s565_s12] sm:$0x3]  ;;  %s5183_s12 = sadd.s32 4294967295, %s3521_s20  }
 0x2a4   : > { %v2017_v22 = vadd.f32 %v2016_v28, %v2015_v53  ;;  %3138 = vmatprep.mubr.msk.f32.mxu0 %vm1774_vm4, %v1969_v7  ;;  %v3358_v56 = vpop.eup %3357  ;;  %v1976_v39 = vsel %vm746_vm0, %v3356_v11, 0.0  ;;  %v2030_v34 = vsel %vm1774_vm4, %v1975_v37, 0.0  ;;  %v1847_v53 = vmul.f32 1.442695, %v1846_v8  ;;  %s4886_s26 = sand.u32 1, %s5183_s12   ;;  %s3529_s12 = smov [#allocation4]  }
 0x2a5   : > { %v1977_v12 = vsel %vm747_vm5, %v3358_v56, 0.0  ;;  %v2032_v43 = vsel %vm1774_vm4, %v1976_v39, 0.0  ;;  %v5066_v11 = vmov 1.0   ;;  %s2575_s15 = scalar_lea.sflag [#allocation5], %s4886_s26  ;;  %s3377_s1 = sshll.u32 %s3529_s12, 4  ;;  %s3378_s1 = int_to_ptr.vmem [resolvable:$false] %s3377_s1 }
 0x2a6   : > { %v2019_v63 = vadd.f32 %v2018_v3, %v2017_v22  ;;  %v3360_v42 = vpop.eup %3359  ;;  %v2034_v1 = vsel %vm1774_vm4, %v1977_v12, 0.0  ;;  %3367 = vpow2.f32 %v1847_v53  ;;  %s3379_s2 = scalar_lea.vmem %s3378_s1, 32  ;;  %p3380_p5 = scmp.lt.s32.totalorder %s2606_s28, %s3378_s1 }
 0x2a7   : > { %3139 = vmatmul.mubr.msk.f32.gmra.mxu0 %vm1774_vm4, %v1970_v20  ;;  %v3362_v54 = vpop.eup %3361  ;;  %v1978_v23 = vsel %vm748_vm11, %v3360_v42, 0.0  ;;  %p3381_p6 = scmp.lt.s32.totalorder %s3379_s2, %s3373_s0 }
 0x2a8   : > { %v2021_v38 = vadd.f32 %v2020_v52, %v2019_v63  ;;  %3141 = vmatprep.mubr.msk.f32.mxu0 %vm1774_vm4, %v1971_v41  ;;  %v1979_v29 = vsel %vm749_vm9, %v3362_v54, 0.0  ;;  %v3364_v61 = vpop.eup %3363  ;;  %v2036_v19 = vsel %vm1774_vm4, %v1978_v23, 0.0  ;;  %vm3528_vm9 = vmmov 0  }
 0x2a9   : > { %v2038_v60 = vsel %vm1774_vm4, %v1979_v29, 0.0  ;;  %v1981_v22 = vsel %vm751_vm1, %v3364_v61, 0.0  ;;  %p3382_p7 = por %p3381_p6, %p3380_p5 }
 0x2aa   : > { %v2023_v33 = vadd.f32 %v2022_v59, %v2021_v38  ;;  %v3366_v7 = vpop.eup %3365  ;;  %v2042_v8 = vsel %vm1774_vm4, %v1981_v22, 0.0  ;;  %v3073_v38 = vpop.f32.mrf.mxu1 }
 0x2ab   : > { %3142 = vmatmul.mubr.msk.f32.gmra.mxu0 %vm1774_vm4, %v1972_v55  ;;  %v1982_v13 = vsel %vm5162_vm2, %v3366_v7, 0.0  ;;  %p3383_p8 = pnand %p3382_p7, %p3376_p4 }
 0x2ac   : > { %v2025_v27 = vadd.f32 %v2024_v32, %v2023_v33  ;;  %3144 = vmatprep.mubr.msk.f32.mxu0 %vm1774_vm4, %v1973_v24  ;;  %v2044_v21 = vsel %vm1774_vm4, %v1982_v13, 0.0  ;;  %v1615_v40 = vpop.f32.mrf.mxu1  ;;  %v5165_v32 = vld [vmem:[#allocation20_spill] sm:$0xff] }
 0x2ae   : > { %v2027_v35 = vadd.f32 %v2026_v15, %v2025_v27  ;;  %v3074_v55 = vpop.f32.mrf.mxu1  ;;  %v5166_v27 = vsub.s32 1, %v5165_v32 }
 0x2af   : > { %3145 = vmatmul.mubr.msk.f32.gmra.mxu0 %vm1774_vm4, %v1974_v17  ;;  %v1627_v54 = vadd.f32 %v3074_v55, %v4742_v5 }
 0x2b0   : > { %v2029_v14 = vadd.f32 %v2028_v49, %v2027_v35  ;;  %3147 = vmatprep.mubr.msk.f32.mxu0 %vm1774_vm4, %v1975_v37  ;;  %v1618_v2 = vpop.f32.mrf.mxu1  ;;  %v763_v46 = vrot.slane %v4716_v9, %v5166_v27 }
 0x2b2   : > { %v2031_v44 = vadd.f32 %v2030_v34, %v2029_v14  ;;  %v3077_v59 = vpop.f32.mrf.mxu1  ;;  %vm765_vm5 = vcmp.eq.s32.totalorder %v5165_v32, %v763_v46 }
 0x2b3   : > { %3148 = vmatmul.mubr.msk.f32.gmra.mxu0 %vm1774_vm4, %v1976_v39  ;;  %v4705_v41 = vpop.eup %3367  ;;  %2874 = vmatprep.mubr.msk.f32.mxu1 %vm765_vm5, %v5066_v11  ;;  %v1619_v39 = vadd.f32 %v4742_v5, %v1618_v2 }
 0x2b4   : > { %v2033_v18 = vadd.f32 %v2032_v43, %v2031_v44  ;;  %3150 = vmatprep.mubr.msk.f32.mxu0 %vm1774_vm4, %v1977_v12  ;;  %5163 = vst [vmem:[#allocation21_spill] sm:$0xff] %v4705_v41  ;;  %v2563_v57 = vmul.f32 %v4705_v41, %v2562_v62  ;;  %v1631_v33 = vpop.f32.mrf.mxu1  ;;  %v1616_v44 = vadd.f32 %v4742_v5, %v1615_v40 }
 0x2b5   : > { %v1632_v53 = vadd.f32 %v4742_v5, %v1631_v33 }
 0x2b6   : > { %v2035_v48 = vadd.f32 %v2034_v1, %v2033_v18  ;;  %v3078_v36 = vpop.f32.mrf.mxu1 }
 0x2b7   : > { %3151 = vmatmul.mubr.msk.f32.gmra.mxu0 %vm1774_vm4, %v1978_v23  ;;  %v1624_v23 = vadd.f32 %v3073_v38, %v4742_v5 }
 0x2b8   : > { %v2037_v25 = vadd.f32 %v2036_v19, %v2035_v48  ;;  %3153 = vmatprep.mubr.msk.f32.mxu0 %vm1774_vm4, %v1979_v29  ;;  %v1634_v24 = vpop.f32.mrf.mxu1 }
 0x2b9   : > { %v1635_v26 = vadd.f32 %v4742_v5, %v1634_v24 }
 0x2ba   : > { %v2039_v28 = vadd.f32 %v2038_v60, %v2037_v25  ;;  %v4721_v17 = vpop.f32.mrf.mxu1  ;;  %v1643_v60 = vadd.f32 %v3078_v36, %v4742_v5 }
 0x2bb   : > { %3154 = vmatmul.mubr.msk.f32.gmra.mxu0 %vm1774_vm4, %v4505_v50 }
 0x2bc   : > { %v2041_v4 = vadd.f32 %v2040_v0, %v2039_v28  ;;  %3156 = vmatprep.mubr.msk.f32.mxu0 %vm1774_vm4, %v1981_v22  ;;  %v4725_v15 = vpop.f32.mrf.mxu1  ;;  %v1640_v0 = vadd.f32 %v3077_v59, %v4742_v5 }
 0x2be   : > { %v2043_v20 = vadd.f32 %v2042_v8, %v2041_v4  ;;  %v4727_v35 = vpop.f32.mrf.mxu1 }
 0x2bf   : > { %3157 = vmatmul.mubr.msk.f32.gmra.mxu0 %vm1774_vm4, %v1982_v13 }
 0x2c0   : > { %v2045_v3 = vadd.f32 %v2044_v21, %v2043_v20  ;;  %v4729_v10 = vpop.f32.mrf.mxu1 }
 0x2c2   : > { %v2046_v31 = vrot.slane %v2045_v3, 4  ;;  %v4731_v37 = vpop.f32.mrf.mxu1 }
 0x2c3   : > { %v1672_v41 = vadd.f32 %v4731_v37, %v4742_v5 }
 0x2c4   : > { %v2047_v63 = vadd.f32 %v2046_v31, %v2045_v3  ;;  %v4733_v56 = vpop.f32.mrf.mxu1 }
 0x2c6   : > { %v2048_v50 = vrot.slane %v2047_v63, 2  ;;  %v4735_v49 = vpop.f32.mrf.mxu1 }
 0x2c8   : > { %v2049_v47 = vadd.f32 %v2048_v50, %v2047_v63  ;;  %v4737_v14 = vpop.f32.mrf.mxu1 }
 0x2ca   : > { %v2050_v52 = vrot.slane %v2049_v47, 1  ;;  %v4745_v42 = vpop.f32.mrf.mxu1 }
 0x2cc   : > { %v2051_v16 = vadd.f32 %v2050_v52, %v2049_v47  ;;  %v4753_v18 = vpop.f32.mrf.mxu1 }
 0x2ce   : > { %v2564_v6 = vadd.f32 %v2563_v57, %v2051_v16  ;;  %v4761_v61 = vpop.f32.mrf.mxu1 }
 0x2d0   : > { %2565 = vst.msk [vmem:[%s3706_s10] sm:$0x1] %vm2560_vm7, %v2564_v6  ;;  %v4769_v30 = vpop.f32.mrf.mxu1 }
 0x2d2   : > { %v4776_v20 = vpop.f32.mrf.mxu1 }
 0x2d4   : > { %v4782_v31 = vpop.f32.mrf.mxu1 }
 0x2d6   : > { %v4786_v47 = vpop.f32.mrf.mxu1 }
 0x2d8   : > { %v4788_v16 = vpop.f32.mrf.mxu1 }
 0x2da   : > { %v3097_v38 = vpop.f32.mrf.mxu1 }
 0x2dc   : > { %v1711_v2 = vpop.f32.mrf.mxu1 }
 0x2de   : > { %v3098_v36 = vpop.f32.mrf.mxu1 }
 0x2df   : > { %v1723_v37 = vadd.f32 %v3098_v36, %v4742_v5 }
 0x2e0   : > { %v1714_v46 = vpop.f32.mrf.mxu1 }
 0x343   : > { %v3113_v34 = vpop.f32.mrf.mxu0 }
 0x344   : > { %v4748_v51 = vmul.f32 %v3113_v34, %v1619_v39 }
 0x345   : > { %v2218_v12 = vpop.f32.mrf.mxu0 }
 0x346   : > { %5167 = vst [vmem:[#allocation23_spill] sm:$0xff] %v4748_v51  ;;  %v4751_v43 = vmul.f32 %v2218_v12, %v1616_v44  ;;  %v3101_v44 = vpop.f32.mrf.mxu1 }
 0x347   : > { %v3116_v45 = vpop.f32.mrf.mxu0 }
 0x348   : > { %5168 = vst [vmem:[#allocation22_spill] sm:$0xff] %v4751_v43  ;;  %v4756_v1 = vmul.f32 %v3116_v45, %v1627_v54  ;;  %v1727_v45 = vpop.f32.mrf.mxu1 }
 0x349   : > { %v2228_v48 = vpop.f32.mrf.mxu0 }
 0x34a   : > { %v4759_v29 = vmul.f32 %v2228_v48, %v1624_v23 }
 0x34b   : > { %v3119_v19 = vpop.f32.mrf.mxu0 }
 0x34c   : > { %5169 = vst [vmem:[#allocation24_spill] sm:$0xff] %v4759_v29  ;;  %v4764_v25 = vmul.f32 %v3119_v19, %v1635_v26  ;;  %v3102_v26 = vpop.f32.mrf.mxu1 }
 0x34d   : > { %v2238_v7 = vpop.f32.mrf.mxu0 }
 0x34e   : > { %v4767_v28 = vmul.f32 %v2238_v7, %v1632_v53  ;;  %v1739_v7 = vadd.f32 %v3102_v26, %v4742_v5  ;;  %v1667_v26 = vadd.f32 %v4742_v5, %v4737_v14 }
 0x34f   : > { %v3122_v22 = vpop.f32.mrf.mxu0 }
 0x350   : > { %v4772_v4 = vmul.f32 %v3122_v22, %v1643_v60  ;;  %v1675_v60 = vadd.f32 %v4735_v49, %v4742_v5  ;;  %v1730_v22 = vpop.f32.mrf.mxu1  ;;  %v1728_v49 = vadd.f32 %v4742_v5, %v1727_v45 }
 0x351   : > { %v2248_v13 = vpop.f32.mrf.mxu0  ;;  %v1731_v51 = vadd.f32 %v4742_v5, %v1730_v22 }
 0x352   : > { %v4774_v8 = vmul.f32 %v2248_v13, %v1640_v0  ;;  %v1736_v13 = vadd.f32 %v3101_v44, %v4742_v5  ;;  %v1664_v44 = vadd.f32 %v4742_v5, %v4733_v56  ;;  %v1715_v56 = vadd.f32 %v4742_v5, %v1714_v46 }
 0x353   : > { %v4778_v21 = vpop.f32.mrf.mxu0 }
 0x355   : > { %v4780_v3 = vpop.f32.mrf.mxu0 }
 0x357   : > { %v3128_v63 = vpop.f32.mrf.mxu0 }
 0x359   : > { %v4784_v50 = vpop.f32.mrf.mxu0 }
 0x35b   : > { %v3131_v62 = vpop.f32.mrf.mxu0 }
 0x35d   : > { %v2278_v52 = vpop.f32.mrf.mxu0 }
 0x35f   : > { %v3134_v57 = vpop.f32.mrf.mxu0 }
 0x360   : > { %v2392_v43 = vmul.f32 %v3134_v57, %v1675_v60 }
 0x361   : > { %v2288_v6 = vpop.f32.mrf.mxu0 }
 0x362   : > { %v2391_v29 = vmul.f32 %v2288_v6, %v1672_v41  ;;  %v1720_v41 = vadd.f32 %v3097_v38, %v4742_v5  ;;  %v1648_v38 = vadd.f32 %v4742_v5, %v4725_v15  ;;  %v1699_v15 = vadd.f32 %v4742_v5, %v4788_v16 }
 0x363   : > { %v4790_v40 = vpop.f32.mrf.mxu0  ;;  %v1688_v16 = vadd.f32 %v4745_v42, %v4742_v5 }
 0x364   : > { %5170 = vst [vmem:[#allocation25_spill] sm:$0xff] %v4790_v40 }
 0x365   : > { %v4792_v55 = vpop.f32.mrf.mxu0 }
 0x366   : > { %5171 = vst [vmem:[#allocation26_spill] sm:$0xff] %v4792_v55 }
 0x367   : > { %v4794_v59 = vpop.f32.mrf.mxu0 }
 0x369   : > { %v4796_v33 = vpop.f32.mrf.mxu0 }
 0x36b   : > { %v4798_v24 = vpop.f32.mrf.mxu0  ;;  %v5172_v42 = vld [vmem:[#allocation25_spill] sm:$0xff] }
 0x36d   : > { %v4800_v27 = vpop.f32.mrf.mxu0 }
 0x36f   : > { %v3146_v39 = vpop.f32.mrf.mxu0 }
 0x371   : > { %v4802_v34 = vpop.f32.mrf.mxu0 }
 0x373   : > { %v3149_v12 = vpop.f32.mrf.mxu0 }
 0x374   : > { %v2402_v6 = vmul.f32 %v3149_v12, %v1715_v56  ;;  %v3371_v12 = vld [vmem:[%s4999_s11 + $0x8] sm:$0xff] }
 0x375   : > { %v2338_v54 = vpop.f32.mrf.mxu0 }
 0x377   : > { %v3152_v23 = vpop.f32.mrf.mxu0 }
 0x378   : > { %v2404_v14 = vmul.f32 %v3152_v23, %v1723_v37 }
 0x379   : > { %v2348_v48 = vpop.f32.mrf.mxu0 }
 0x37b   : > { %v3155_v19 = vpop.f32.mrf.mxu0 }
 0x37c   : > { %v2406_v40 = vmul.f32 %v3155_v19, %v1731_v51  ;;  %v1656_v51 = vadd.f32 %v4721_v17, %v4742_v5 }
 0x37d   : > { %v2358_v53 = vpop.f32.mrf.mxu0 }
 0x37e   : > { %v2405_v57 = vmul.f32 %v2358_v53, %v1728_v49 }
 0x37f   : > { %v3158_v0 = vpop.f32.mrf.mxu0 }
 0x380   : > { %v2408_v11 = vmul.f32 %v3158_v0, %v1739_v7  ;;  %v2390_v7 = vmul.f32 %v3131_v62, %v1667_v26  ;;  %v1651_v62 = vadd.f32 %v4742_v5, %v4729_v10  ;;  %v2385_v10 = vmul.f32 %v4780_v3, %v1648_v38 }
 0x381   : > { %v2368_v32 = vpop.f32.mrf.mxu0  ;;  %v2398_v3 = vmul.f32 %v4798_v24, %v1699_v15 }
 0x382   : > { %v2407_v55 = vmul.f32 %v2368_v32, %v1736_v13  ;;  %2967 = vmatprep.subr.mxu1 %v2408_v11  ;;  %v1659_v32 = vadd.f32 %v4727_v35, %v4742_v5  ;;  %v2389_v11 = vmul.f32 %v2278_v52, %v1664_v44  ;;  %v2387_v35 = vmul.f32 %v4784_v50, %v1656_v51 }
 0x383   : > { %2968 = vmatpush3.msra.mxu1 %v2392_v43  ;;  %v1712_v52 = vadd.f32 %v4742_v5, %v1711_v2  ;;  %v2386_v17 = vmul.f32 %v4778_v21, %v1651_v62  ;;  %v1704_v50 = vadd.f32 %v4776_v20, %v4742_v5  ;;  %v1691_v20 = vadd.f32 %v4761_v61, %v4742_v5 }
 0x384   : > { %2969 = vmatprep.subr.mxu1 %v2407_v55  ;;  %v2388_v43 = vmul.f32 %v3128_v63, %v1659_v32  ;;  %v1707_v63 = vadd.f32 %v4786_v47, %v4742_v5  ;;  %v1696_v47 = vadd.f32 %v4742_v5, %v4782_v31  ;;  %v1683_v31 = vadd.f32 %v4742_v5, %v4769_v30  ;;  %v5175_v30 = vld [vmem:[#allocation23_spill] sm:$0xff] }
 0x385   : > { %2970 = vmatpush3.msra.mxu1 %v2391_v29  ;;  %v2403_v29 = vmul.f32 %v2348_v48, %v1720_v41  ;;  %v2399_v21 = vmul.f32 %v4802_v34, %v1704_v50  ;;  %v759_v61 = vrot.slane %v4716_v9, %v3841_v58  ;;  %v5178_v9 = vmov 1.0   ;;  %v2479_v34 = vld [vmem:[%s5181_s29] sm:$0xff] }
 0x386   : > { %2971 = vmatprep.subr.mxu1 %v2406_v40  ;;  %v2401_v40 = vmul.f32 %v2338_v54, %v1712_v52  ;;  %v2400_v55 = vmul.f32 %v3146_v39, %v1707_v63  ;;  %v2397_v2 = vmul.f32 %v4800_v27, %v1696_v47  ;;  %v2394_v36 = vmul.f32 %v5172_v42, %v1683_v31  ;;  %v3370_v39 = vld [vmem:[%s4999_s11 + $0x10] sm:$0xff] }
 0x387   : > { %2972 = vmatpush3.msra.mxu1 %v2390_v7  ;;  %v3527_v27 = vmov 0.0  }
 0x388   : > { %2973 = vmatprep.subr.mxu1 %v2405_v57 }
 0x389   : > { %2974 = vmatpush3.msra.mxu1 %v2389_v11 }
 0x38a   : > { %2975 = vmatprep.subr.mxu1 %v2404_v14 }
 0x38b   : > { %2976 = vmatpush3.msra.mxu1 %v2388_v43 }
 0x38c   : > { %2977 = vmatprep.subr.mxu1 %v2403_v29 }
 0x38d   : > { %2978 = vmatpush3.msra.mxu1 %v2387_v35 }
 0x38e   : > { %2979 = vmatprep.subr.mxu1 %v2402_v6 }
 0x38f   : > { %2980 = vmatpush3.msra.mxu1 %v2386_v17 }
 0x390   : > { %2981 = vmatprep.subr.mxu1 %v2401_v40 }
 0x391   : > { %2982 = vmatpush3.msra.mxu1 %v2385_v10 }
 0x392   : > { %2983 = vmatprep.subr.mxu1 %v2400_v55 }
 0x393   : > { %2984 = vmatpush3.msra.mxu1 %v4772_v4  ;;  %v2396_v4 = vmul.f32 %v4794_v59, %v1691_v20  ;;  %v5173_v59 = vld [vmem:[#allocation24_spill] sm:$0xff] }
 0x394   : > { %2985 = vmatprep.subr.mxu1 %v2399_v21 }
 0x395   : > { %2986 = vmatpush3.msra.mxu1 %v4774_v8  ;;  %v2395_v8 = vmul.f32 %v4796_v33, %v1688_v16  ;;  %v5176_v33 = vld [vmem:[#allocation20_spill] sm:$0xff] }
 0x396   : > { %2987 = vmatprep.subr.mxu1 %v2398_v3  ;;  %vm764_vm7 = vcmp.eq.s32.totalorder %v5176_v33, %v759_v61 }
 0x397   : > { %2988 = vmatpush3.msra.mxu1 %v4764_v25  ;;  %v1680_v25 = vadd.f32 %v4742_v5, %v4753_v18  ;;  %v3369_v5 = vld [vmem:[%s4999_s11 + $0x18] sm:$0xff] }
 0x398   : > { %2989 = vmatprep.subr.mxu1 %v2397_v2  ;;  %v5180_v18 = vld [vmem:[#allocation21_spill] sm:$0xff] }
 0x399   : > { %2990 = vmatpush3.msra.mxu1 %v4767_v28  ;;  %v5174_v28 = vld [vmem:[#allocation26_spill] sm:$0xff]  ;;  %v2484_v46 = vrot.slane %v5180_v18, %v3841_v58 }
 0x39a   : > { %2991 = vmatprep.subr.mxu1 %v2396_v4  ;;  %v2393_v24 = vmul.f32 %v5174_v28, %v1680_v25  ;;  %v3372_v58 = vld [vmem:[%s4999_s11] sm:$0xff] }
 0x39b   : > { %2992 = vmatpush3.msra.mxu1 %v4756_v1  ;;  %v5177_v1 = vld [vmem:[#allocation22_spill] sm:$0xff]  ;;  %v2486_v54 = vmul.f32 %v2484_v46, %v2479_v34 }
 0x39c   : > { %2993 = vmatprep.subr.mxu1 %v2395_v8 }
 0x39d   : > { %2994 = vmatpush3.msra.mxu1 %v5173_v59 }
 0x39e   : > { %2995 = vmatprep.subr.mxu1 %v2394_v36 }
 0x39f   : > { %2996 = vmatpush3.msra.mxu1 %v5175_v30 }
 0x3a0   : > { %2997 = vmatprep.subr.mxu1 %v2393_v24 }
 0x3a1   : > { %2998 = vmatpush3.msra.mxu1 %v5177_v1 }
 0x3a2   : > { %3159 = vmatprep.subr.mxu1 %v3527_v27  ;;  %2875 = vmatmul.mubr.msk.f32.vlgmr.msra.gmra.mxu1 %vm764_vm7, %v5178_v9 }
 0x3a3   : > { %3160 = vmatpush3.msra.mxu1 %v3369_v5  ;;  %3167 = vmatprep.mubr.msk.f32.mxu1 %vm3528_vm9, %v3527_v27 }
 0x3a4   : > { %3161 = vmatprep.subr.mxu1 %v3527_v27 }
 0x3a5   : > { %3162 = vmatpush3.msra.mxu1 %v3370_v39 }
 0x3a6   : > { %3163 = vmatprep.subr.mxu1 %v3527_v27 }
 0x3a7   : > { %3164 = vmatpush3.msra.mxu1 %v3371_v12 }
 0x3a8   : > { %3165 = vmatprep.subr.mxu1 %v3527_v27 }
 0x3a9   : > { %3166 = vmatpush3.msra.mxu1 %v3372_v58 }
 0x3aa   : > { %3168 = vmatmul.mubr.msk.f32.vlgmr.msra.gmra.mxu1 %vm1774_vm4, %v2486_v54 }
 0x3ab   : > { %3386 = shalt.err (!%p3383_p8)
}
 0x3ac   : > { %s3387_s10 = scalar_lea.hbm %s4892_s27, 16  ;;  %s3391_s19 = scalar_lea.hbm %s5184_s24, 32 }
 0x3ad   : > { %p3388_p10 = scmp.ne.s32.totalorder %s4892_s27, %s3387_s10  ;;  %p3392_p13 = scmp.lt.s32.totalorder %s4892_s27, %s5184_s24 }
 0x3ae   : > { %p3393_p0 = scmp.lt.s32.totalorder %s3391_s19, %s3387_s10 }
 0x3af   : > { %p3389_p11 = pnand %p3388_p10, %p3658_p3 }
 0x3b0   : > { %p3394_p1 = por %p3393_p0, %p3392_p13 }
 0x3b1   : > { %p3390_p12 = pneg %p3389_p11 }
 0x3b3   : > { %p3395_p2 = pnand %p3394_p1, %p3390_p12 }
 0x3b5   : > { %3398 = shalt.err (!%p3395_p2)
}
 0x3b6   : > { %3171 = dma.vmem_to_hbm [thread:$0]  (%p3658_p3), %s2606_s28, 16, %s4892_s27, %s2575_s15  }
 0x3b7   : > { %s2592_s0 = sshll.u32 %s3703_s25, 4  ;;  %s2571_s1 = scalar_lea.sflag [#allocation3], %s3681_s22  ;;  %s2593_s0 = int_to_ptr.vmem [resolvable:$true] %s2592_s0 }
 0x3b8   : > { %s3399_s2 = scalar_lea.vmem %s2593_s0, 16  ;;  %s3530_s12 = smov [#allocation2]  }
 0x3b9   : > { %p3400_p4 = scmp.ne.s32.totalorder %s2593_s0, %s3399_s2  ;;  %s3403_s10 = sshll.u32 %s3530_s12, 4  ;;  %s3404_s10 = int_to_ptr.vmem [resolvable:$false] %s3403_s10 }
 0x3ba   : > { %s3405_s16 = scalar_lea.vmem %s3404_s10, 32  ;;  %p3406_p7 = scmp.lt.s32.totalorder %s2593_s0, %s3404_s10 }
 0x3bb   : > { %p3401_p5 = pnand %p3400_p4, %p3658_p3  ;;  %p3407_p8 = scmp.lt.s32.totalorder %s3405_s16, %s3399_s2 }
 0x3bd   : > { %p3402_p6 = pneg %p3401_p5  ;;  %p3408_p10 = por %p3407_p8, %p3406_p7 }
 0x3bf   : > { %p3409_p11 = pnand %p3408_p10, %p3402_p6 }
 0x3c1   : > { %3412 = shalt.err (!%p3409_p11)
}
 0x3c2   : > { %s3413_s25 = scalar_lea.hbm %s4898_s30, 16  ;;  %s3417_s28 = scalar_lea.hbm %s5185_s13, 32 }
 0x3c3   : > { %p3414_p12 = scmp.ne.s32.totalorder %s4898_s30, %s3413_s25  ;;  %p3418_p1 = scmp.lt.s32.totalorder %s4898_s30, %s5185_s13 }
 0x3c4   : > { %p3419_p2 = scmp.lt.s32.totalorder %s3417_s28, %s3413_s25 }
 0x3c5   : > { %p3415_p13 = pnand %p3414_p12, %p3658_p3 }
 0x3c6   : > { %p3420_p4 = por %p3419_p2, %p3418_p1 }
 0x3c7   : > { %p3416_p0 = pneg %p3415_p13 }
 0x3c9   : > { %p3421_p5 = pnand %p3420_p4, %p3416_p0 }
 0x3cb   : > { %3424 = shalt.err (!%p3421_p5)
}
 0x3cc   : > { %3170 = dma.vmem_to_hbm [thread:$0]  (%p3658_p3), %s2593_s0, 16, %s4898_s30, %s2571_s1   ;;  %v2566_v48 = vld [vmem:[%s3708_s17] sm:$0xff] }
 0x3cd   : > { %s2880_s29 = sshll.u32 %s5179_s21, 7  ;;  %s2618_s23 = sshll.u32 %s3708_s17, 4  ;;  %s2619_s23 = int_to_ptr.vmem [resolvable:$true] %s2618_s23 }
 0x3ce   : > { %s5186_s10 = sld [smem:[#allocation53_spill]]  ;;  %s3425_s25 = scalar_lea.vmem %s2619_s23, 128 }
 0x3cf   : > { %p3426_p6 = scmp.ne.s32.totalorder %s2619_s23, %s3425_s25  ;;  %s3531_s30 = smov [#allocation6]  }
 0x3d0   : > { %s3429_s0 = sshll.u32 %s3531_s30, 4  ;;  %s3430_s0 = int_to_ptr.vmem [resolvable:$false] %s3429_s0 }
 0x3d1   : > { %p3427_p7 = pnand %p3426_p6, %p3658_p3  ;;  %s3431_s21 = scalar_lea.vmem %s3430_s0, 256 }
 0x3d2   : > { %p3432_p10 = scmp.lt.s32.totalorder %s2619_s23, %s3430_s0  ;;  %p3433_p11 = scmp.lt.s32.totalorder %s3431_s21, %s3425_s25 }
 0x3d3   : > { %p3428_p8 = pneg %p3427_p7 }
 0x3d4   : > { %s2616_s16 = scalar_lea.hbm %s5186_s10, %s2880_s29  ;;  %p3434_p12 = por %p3433_p11, %p3432_p10 }
 0x3d6   : > { %p3435_p13 = pnand %p3434_p12, %p3428_p8 }
 0x462   : > { %v2999_v45 = vpop.f32.mrf.mxu1 }
 0x464   : > { %v3000_v23 = vpop.f32.mrf.mxu1 }
 0x465   : > { %v3001_v53 = vadd.f32 %v3000_v23, %v2999_v45 }
 0x46a   : > { %v2556_v19 = vpop.f32.mrf.mxu1 }
 0x46b   : > { %v2567_v60 = vmul.f32 %v2566_v48, %v2556_v19 }
 0x46c   : > { %v3169_v22 = vpop.f32.mrf.mxu1 }
 0x46d   : > { %v2568_v0 = vadd.f32 %v3001_v53, %v2567_v60 }
 0x46f   : > { %2569 = vst [vmem:[%s3708_s17] sm:$0xff] %v2568_v0 }
 0x470   : > { %3438 = shalt.err (!%p3435_p13)
}
 0x471   : > { %s3439_s1 = scalar_lea.hbm %s2616_s16, 128  ;;  %s3443_s27 = scalar_lea.hbm %s5186_s10, 256 }
 0x472   : > { %p3440_p0 = scmp.ne.s32.totalorder %s2616_s16, %s3439_s1  ;;  %p3444_p4 = scmp.lt.s32.totalorder %s2616_s16, %s5186_s10 }
 0x473   : > { %p3445_p5 = scmp.lt.s32.totalorder %s3443_s27, %s3439_s1 }
 0x474   : > { %p3441_p1 = pnand %p3440_p0, %p3658_p3 }
 0x475   : > { %p3446_p6 = por %p3445_p5, %p3444_p4 }
 0x476   : > { %p3442_p2 = pneg %p3441_p1 }
 0x478   : > { %p3447_p7 = pnand %p3446_p6, %p3442_p2 }
 0x47a   : > { %3450 = shalt.err (!%p3447_p7)
}
 0x47b   : > { %3172 = dma.vmem_to_hbm [thread:$0]  (%p3658_p3), %s2619_s23, 128, %s2616_s16, %s2575_s15  }
 0x47c PF: > { %s5187_s19 = sld [smem:[#allocation9_spill]]  ;;  %p3186_p8 = scmp.ge.s32.totalorder %s3521_s20, 2 }
 0x47e   : > { %p3177_p10 = pnand %p3186_p8, %p3670_p9 }
 0x480   : > { %p3178_p11 = pneg %p3177_p10 }
 0x482   : > { %s2630_s2 = sand.u32 1, %s5187_s19  }
 0x483   : > { %s2631_s12 = scalar_lea.sflag [#allocation3], %s2630_s2 }
 0x484   : > { %3484 = dma.done.wait (%p3178_p11), %s2631_s12, 16  }
 0x485   : > { %3486 = vsyncadd (%p3178_p11), %s2631_s12, 4294967280  ;;  %s5189_s25 = sadd.s32 4294967294, %s3521_s20  }
 0x486   : > { %s2638_s30 = sand.u32 1, %s5189_s25  }
 0x487   : > { %s2639_s0 = scalar_lea.sflag [#allocation5], %s2638_s30 }
 0x488   : > { %3488 = dma.done.wait (%p3178_p11), %s2639_s0, 144  }
 0x489   : > { %3490 = vsyncadd (%p3178_p11), %s2639_s0, 4294967152  ;;  %s31_s20 = sadd.s32 1, %s3521_s20   ;;  %s5190_s29 = sld [smem:[#allocation10_spill]] }
 0x48a   : > { %p28_p3 = scmp.ge.s32.totalorder %s31_s20, 6   ;;  %s5191_s30 = sld [smem:[#allocation11_spill]] }
 0x48b   : > { %s5192_s15 = sld [smem:[#allocation19_spill]] }
 0x48c   : > { %s5193_s16 = sld [smem:[#allocation13_spill]]  ;;  %30 = sbr.rel (!%p28_p3) target bundleno = 15 (0xf), region = 145 }
 0x48d   : > { %s5194_s17 = sld [smem:[#allocation14_spill]] }
 0x48e   : > { %s5195_s18 = sld [smem:[#allocation15_spill]] }
 0x48f   : > { %s5196_s19 = sld [smem:[#allocation17_spill]] }
 0x491   :  { %2652 = vsyncpa [#allocation3], 1 }
 0x492   :  { %2654 = vsyncpa [#allocation3 + $0x1], 1 }
 0x493   :  { %2655 = vsyncpa [#allocation5], 1 }
 0x494   :  { %2657 = vsyncpa [#allocation5 + $0x1], 1 }

</bundles_post_ra>
